<compile_context>
chip_gen: v5e
topology: v5e:2x2
jax: 0.10.0
libtpu: 0.0.40
codegen_flags: <defaults>
</compile_context>

<pallas_src>
import functools

import jax
import jax.numpy as jnp
import numpy as np
from jax.experimental import pallas as pl
from jax.experimental.pallas import tpu as pltpu

# ----------------------------- configuration --------------------------------
ENCODER_DEPTH = 2
TOTAL_RELATIONS = 16
TOTAL_CLASSES = 8          # == input channels == transformer sequence length
HEIGHT, WIDTH = 4, 8       # adaptive-pool output -> embed_dim = 32
NUM_HEADS = 1
BATCH = 2
H_IN, W_IN = 16, 16

EMBED = HEIGHT * WIDTH      # 32
MLP_HID = 3 * EMBED         # mlp_ratio = 3
LN_EPS = 1e-5
OUT_LANES = 128             # lane-dense blob / output width (one vreg of lanes)


# ------------------------------- kernel -------------------------------------
def _layernorm(h):
    """LayerNorm WITHOUT affine -- gamma/beta are folded into the consuming
    matmuls host-side (see pack_params)."""
    mu = jnp.mean(h, axis=-1, keepdims=True)
    var = jnp.mean(jnp.square(h - mu), axis=-1, keepdims=True)
    return (h - mu) * jax.lax.rsqrt(var + LN_EPS)


def psg_kernel(x_ref, mat_ref, vec_ref, out_ref, *, depth, num_heads, bb, off):
    f32 = jnp.float32
    bf16 = jnp.bfloat16
    C, D, H3 = TOTAL_CLASSES, EMBED, MLP_HID
    BC = bb * C
    HW = H_IN * W_IN

    def mat(row, nrows, ncols):                    # static bf16 matrix-blob slice
        return mat_ref[row:row + nrows, :ncols]

    def vec(row, w=D, n=1):                        # static f32 vector-blob slice
        return vec_ref[row:row + n, :w]

    def mm(a, w):                                  # bf16 MXU matmul, f32 accumulate
        return jnp.dot(a.astype(bf16), w, preferred_element_type=f32)

    # AdaptiveAvgPool2d as a matmul with the baked pooling matrix, + pos embed
    # (pre-tiled to BC rows).  x_ref is already (BC, HW): no in-kernel reshape.
    x = mm(x_ref[...], mat(off['pool'], HW, D)) + vec(off['pos'], D, BC)   # (BC, D)

    dh = D // num_heads
    # additive block-diagonal mask (0 / -1e30) baked into the blob, hoisted once
    mask = mat(off['mask'], BC, BC).astype(f32) if bb > 1 else None

    for l in range(depth):                         # static (unrolled) loop
        mb = off['lyr_mat'] + l * off['mat_stride']
        vb = off['lyr_vec'] + l * off['vec_stride']

        # ---- pre-norm MHSA (ln1 affine + 1/sqrt(dh) folded into Wq/Wk/Wv) ----
        h = _layernorm(x)
        # TODO(synk): measure split q/k/v dots vs one fused (BC,D)@(D,3D) dot +
        # lane slices (MRF push/pop latency may favor the fused form at M<=16).
        q = mm(h, mat(mb + 0 * D, D, D)) + vec(vb + 0)
        k = mm(h, mat(mb + 1 * D, D, D)) + vec(vb + 1)
        v = mm(h, mat(mb + 2 * D, D, D)) + vec(vb + 2)
        heads = []
        for hh in range(num_heads):
            sl = slice(hh * dh, (hh + 1) * dh)
            # contract last dims directly -> no explicit k.T / XLU transpose
            att = jax.lax.dot_general(q[:, sl].astype(bf16), k[:, sl].astype(bf16),
                                      (((1,), (1,)), ((), ())),
                                      preferred_element_type=f32)
            if mask is not None:
                att = att + mask
            att = att - jnp.max(att, axis=-1, keepdims=True)
            p = jnp.exp(att)
            p = p * pl.reciprocal(jnp.sum(p, axis=-1, keepdims=True), approx=True)
            heads.append(jnp.dot(p, v[:, sl], preferred_element_type=f32))
        attn = heads[0] if num_heads == 1 else jnp.concatenate(heads, axis=-1)
        x = x + mm(attn, mat(mb + 3 * D, D, D)) + vec(vb + 3)

        # ---- MLP (ln2 affine folded into W1/b1; GELU, mlp_ratio=3) ----
        h2 = _layernorm(x)
        m = mm(h2, mat(mb + 4 * D, D, H3)) + vec(vb + 4, H3)
        # TODO(synk): PyTorch nn.GELU defaults to exact erf; tanh approx used here.
        m = jax.nn.gelu(m, approximate=True)
        x = x + mm(m, mat(mb + 5 * D, H3, D)) + vec(vb + 5)

    # final LN (affine folded into the head) + fused relation head:
    #   rel_b = sum_seq(norm(x_b)) @ diag(lnfg)(Ws+Wo) + C*(lnfb@(Ws+Wo)+bs+bo)
    x = _layernorm(x)
    seg = mat(off['seg'], bb, BC)                          # per-batch seq-sum selector
    xs = jnp.dot(seg, x.astype(bf16), preferred_element_type=f32)      # (bb, D)
    rel = jnp.dot(xs.astype(bf16), mat(off['w_rel'], D, OUT_LANES),
                  preferred_element_type=f32) + vec(off['b_rel'], OUT_LANES)
    out_ref[0] = rel                                       # (bb, 128), lane-dense


# --------------------------- host-side packing --------------------------------
def make_pool_matrix(h_in, w_in, h_out, w_out):
    """(h_in*w_in, h_out*w_out) numpy matrix reproducing AdaptiveAvgPool2d for
    the evenly-divisible case."""
    assert h_in % h_out == 0 and w_in % w_out == 0, \
        "non-divisible adaptive pooling is not supported"
    kh, kw = h_in // h_out, w_in // w_out
    m = np.zeros((h_in * w_in, h_out * w_out), np.float32)
    for i in range(h_in):
        for j in range(w_in):
            m[i * w_in + j, (i // kh) * w_out + (j // kw)] = 1.0 / (kh * kw)
    return m


def batches_per_grid_step(batch, classes=TOTAL_CLASSES, max_rows=128):
    """Largest divisor of `batch` such that bb*classes stays within one MXU
    tile (<=128 rows), so the block-diagonal score matmul remains a single MXU
    pass and mask waste stays bounded.  Device-independent on purpose: splitting
    a tiny batch across v7x's two TensorCores only duplicates weight DMA and
    grid overhead without shortening the per-core critical path."""
    bb = max(1, min(batch, max_rows // classes))
    while batch % bb:
        bb -= 1
    return bb


def pack_params(params, bb):
    """Fold LN affines + attention scale into the weights and pack everything
    into a bf16 matrix blob + f32 vector blob; returns static row offsets."""
    D, H3, R, L, C = EMBED, MLP_HID, TOTAL_RELATIONS, ENCODER_DEPTH, TOTAL_CLASSES
    BC = bb * C
    W = OUT_LANES
    scale = 1.0 / float(D // NUM_HEADS) ** 0.5

    p = {k: np.asarray(v, np.float32) for k, v in params.items()}

    def padw(a):
        a = np.asarray(a, np.float32)
        if a.ndim == 1:
            a = a[None, :]
        return np.pad(a, ((0, 0), (0, W - a.shape[1])))

    def pad_rows(a, mult):
        r = (-a.shape[0]) % mult
        return a if r == 0 else np.pad(a, ((0, r), (0, 0)))

    off = {'bb': bb}

    # ---- matrix blob (bf16): pool | per-layer [wq wk wv wproj w1 w2] | w_rel
    #                          | mask | seg   (each section 16-row aligned) ----
    mat_rows = []

    def add_mat(sections):
        start = sum(a.shape[0] for a in mat_rows)
        mat_rows.append(pad_rows(np.concatenate(sections, axis=0), 16))
        return start

    off['pool'] = add_mat([padw(make_pool_matrix(H_IN, W_IN, HEIGHT, WIDTH))])

    lyr_starts = []
    for l in range(L):
        g1 = p['ln1g'][l]
        g2 = p['ln2g'][l]
        wqkv = p['wqkv'][l]
        wq, wk, wv = wqkv[:, :D], wqkv[:, D:2 * D], wqkv[:, 2 * D:]
        wq_f = (g1[:, None] * wq) * scale          # ln1 gamma + score scale folded
        wk_f = g1[:, None] * wk
        wv_f = g1[:, None] * wv
        w1_f = g2[:, None] * p['w1'][l]            # ln2 gamma folded
        lyr_starts.append(add_mat([padw(wq_f), padw(wk_f), padw(wv_f),
                                   padw(p['wproj'][l]), padw(w1_f),
                                   padw(p['w2'][l])]))
    off['lyr_mat'] = lyr_starts[0]
    off['mat_stride'] = (lyr_starts[1] - lyr_starts[0]) if L > 1 else 0

    wrel = p['ws'] + p['wo']                       # fused sub+obj head weight
    wrel_f = p['lnfg'][0][:, None] * wrel          # final-LN gamma folded
    off['w_rel'] = add_mat([padw(wrel_f)])

    if bb > 1:
        m = np.full((BC, BC), -1e30, np.float32)   # additive block-diagonal mask
        for b in range(bb):
            m[b * C:(b + 1) * C, b * C:(b + 1) * C] = 0.0
        off['mask'] = add_mat([padw(m)])
    else:
        off['mask'] = 0

    seg = np.zeros((bb, BC), np.float32)           # per-batch seq-sum selector
    for b in range(bb):
        seg[b, b * C:(b + 1) * C] = 1.0
    off['seg'] = add_mat([padw(seg)])

    mat = np.concatenate(mat_rows, axis=0)

    # ---- vector blob (f32): pos(tiled) | per-layer [bq bk bv bproj b1 b2] | b_rel ----
    vec_rows = []

    def add_vec(sections):
        start = sum(a.shape[0] for a in vec_rows)
        vec_rows.append(pad_rows(np.concatenate(sections, axis=0), 8))
        return start

    off['pos'] = add_vec([padw(np.tile(p['pos'], (bb, 1)))])

    vlyr_starts = []
    for l in range(L):
        b1ln = p['ln1b'][l]
        b2ln = p['ln2b'][l]
        wqkv = p['wqkv'][l]
        bqkv = p['bqkv'][l]
        wq, wk, wv = wqkv[:, :D], wqkv[:, D:2 * D], wqkv[:, 2 * D:]
        bq_f = (b1ln @ wq + bqkv[:D]) * scale      # ln1 beta + score scale folded
        bk_f = b1ln @ wk + bqkv[D:2 * D]
        bv_f = b1ln @ wv + bqkv[2 * D:]
        b1_f = b2ln @ p['w1'][l] + p['b1'][l]      # ln2 beta folded
        vlyr_starts.append(add_vec([padw(bq_f), padw(bk_f), padw(bv_f),
                                    padw(p['bproj'][l]), padw(b1_f),
                                    padw(p['b2'][l])]))
    off['lyr_vec'] = vlyr_starts[0]
    off['vec_stride'] = (vlyr_starts[1] - vlyr_starts[0]) if L > 1 else 0

    brel = C * (p['lnfb'][0] @ wrel + p['bs'][0] + p['bo'][0])   # final-LN beta folded
    off['b_rel'] = add_vec([padw(brel)])

    vecb = np.concatenate(vec_rows, axis=0)
    return jnp.asarray(mat, jnp.bfloat16), jnp.asarray(vecb, jnp.float32), off


# ------------------------------ wrapper --------------------------------------
def psg_relation_encoder_forward(x, mat_blob, vec_blob, off, bb):
    """Inference forward: returns rel of shape (B, total_relations)."""
    B, C, h_in, w_in = x.shape
    assert C == TOTAL_CLASSES and h_in == H_IN and w_in == W_IN
    assert B % bb == 0
    assert off['bb'] == bb, "weight blobs were packed for a different bb"
    num_steps = B // bb
    HW = h_in * w_in
    BC, D, R = bb * C, EMBED, TOTAL_RELATIONS

    # pre-reshaped to (B*C, HW): batch folded onto sublanes, no in-kernel reshape
    x_flat = x.reshape(B * C, HW).astype(jnp.float32)
    kernel = functools.partial(psg_kernel, depth=ENCODER_DEPTH,
                               num_heads=NUM_HEADS, bb=bb, off=off)

    flops_step = (2 * BC * HW * D
                  + ENCODER_DEPTH * (3 * 2 * BC * D * D          # q,k,v
                                     + 2 * 2 * BC * BC * D       # scores + att@v
                                     + 2 * BC * D * D            # proj
                                     + 2 * 2 * BC * D * MLP_HID)  # mlp
                  + 2 * bb * BC * D + 2 * bb * D * OUT_LANES)
    cost = pl.CostEstimate(
        flops=num_steps * flops_step,
        transcendentals=num_steps * ENCODER_DEPTH * (BC * BC + BC * MLP_HID),
        bytes_accessed=int(x_flat.size * 4 + mat_blob.size * 2
                           + vec_blob.size * 4 + num_steps * bb * OUT_LANES * 4))

    out = pl.pallas_call(
        kernel,
        grid=(num_steps,),
        in_specs=[pl.BlockSpec((BC, HW), lambda g: (g, 0)),
                  # constant index_map -> blobs fetched once, never re-DMA'd
                  pl.BlockSpec(mat_blob.shape, lambda g: (0, 0)),
                  pl.BlockSpec(vec_blob.shape, lambda g: (0, 0))],
        # lane-dense (128-wide) output block -> unmasked vst writeback
        out_specs=pl.BlockSpec((1, bb, OUT_LANES), lambda g: (g, 0, 0)),
        out_shape=jax.ShapeDtypeStruct((num_steps, bb, OUT_LANES), jnp.float32),
        compiler_params=pltpu.CompilerParams(dimension_semantics=("parallel",)),
        cost_estimate=cost,
    )(x_flat, mat_blob, vec_blob)
    return out.reshape(B, OUT_LANES)[:, :R]


# --------------------------- parameter init ----------------------------------
def init_params(key):
    D, Hd, R, L, C = EMBED, MLP_HID, TOTAL_RELATIONS, ENCODER_DEPTH, TOTAL_CLASSES
    ks = jax.random.split(key, 8)
    s = 0.02
    p = {}
    p['pos'] = s * jax.random.normal(ks[0], (C, D), jnp.float32)
    p['ln1g'] = jnp.ones((L, D), jnp.float32)
    p['ln1b'] = jnp.zeros((L, D), jnp.float32)
    p['wqkv'] = s * jax.random.normal(ks[1], (L, D, 3 * D), jnp.float32)
    p['bqkv'] = jnp.zeros((L, 3 * D), jnp.float32)
    p['wproj'] = s * jax.random.normal(ks[2], (L, D, D), jnp.float32)
    p['bproj'] = jnp.zeros((L, D), jnp.float32)
    p['ln2g'] = jnp.ones((L, D), jnp.float32)
    p['ln2b'] = jnp.zeros((L, D), jnp.float32)
    p['w1'] = s * jax.random.normal(ks[3], (L, D, Hd), jnp.float32)
    p['b1'] = jnp.zeros((L, Hd), jnp.float32)
    p['w2'] = s * jax.random.normal(ks[4], (L, Hd, D), jnp.float32)
    p['b2'] = jnp.zeros((L, D), jnp.float32)
    p['lnfg'] = jnp.ones((1, D), jnp.float32)
    p['lnfb'] = jnp.zeros((1, D), jnp.float32)
    p['ws'] = s * jax.random.normal(ks[5], (D, R), jnp.float32)
    p['bs'] = 0.01 * jnp.ones((1, R), jnp.float32)
    p['wo'] = s * jax.random.normal(ks[6], (D, R), jnp.float32)
    p['bo'] = -0.01 * jnp.ones((1, R), jnp.float32)
    return p


# ---------------------------- pure-JAX reference -----------------------------
def reference_forward(x, params):
    B, C, h_in, w_in = x.shape
    kh, kw = h_in // HEIGHT, w_in // WIDTH
    xp = x.reshape(B, C, HEIGHT, kh, WIDTH, kw).mean(axis=(3, 5))   # adaptive pool
    h = xp.reshape(B, C, EMBED) + params['pos'][None]
    D = EMBED
    dh = D // NUM_HEADS
    scale = 1.0 / float(dh) ** 0.5

    def ln(v, g, b):
        mu = v.mean(-1, keepdims=True)
        var = ((v - mu) ** 2).mean(-1, keepdims=True)
        return (v - mu) * jax.lax.rsqrt(var + LN_EPS) * g + b

    for l in range(ENCODER_DEPTH):
        t = ln(h, params['ln1g'][l], params['ln1b'][l])
        qkv = t @ params['wqkv'][l] + params['bqkv'][l]
        q, k, v = qkv[..., :D], qkv[..., D:2 * D], qkv[..., 2 * D:]
        heads = []
        for hh in range(NUM_HEADS):
            sl = slice(hh * dh, (hh + 1) * dh)
            att = jnp.einsum('bqd,bkd->bqk', q[..., sl], k[..., sl]) * scale
            att = att - att.max(-1, keepdims=True)
            att = jnp.exp(att)
            att = att / att.sum(-1, keepdims=True)
            heads.append(jnp.einsum('bqk,bkd->bqd', att, v[..., sl]))
        a = heads[0] if NUM_HEADS == 1 else jnp.concatenate(heads, axis=-1)
        h = h + a @ params['wproj'][l] + params['bproj'][l]
        t2 = ln(h, params['ln2g'][l], params['ln2b'][l])
        m = jax.nn.gelu(t2 @ params['w1'][l] + params['b1'][l], approximate=True)
        h = h + m @ params['w2'][l] + params['b2'][l]

    h = ln(h, params['lnfg'][0], params['lnfb'][0])
    sub = h @ params['ws'] + params['bs'][0]
    obj = h @ params['wo'] + params['bo'][0]
    rel = jnp.concatenate([sub, obj], axis=1).sum(axis=1)
    return rel


# --------------------------------- main ---------------------------------------
if __name__ == "__main__":
    key = jax.random.PRNGKey(0)
    k_x, k_p = jax.random.split(key)
    x = jax.random.normal(k_x, (BATCH, TOTAL_CLASSES, H_IN, W_IN), jnp.float32)
    params = init_params(k_p)

    bb = batches_per_grid_step(BATCH)            # batches processed per grid step
    mat_blob, vec_blob, off = pack_params(params, bb)

    rel = psg_relation_encoder_forward(x, mat_blob, vec_blob, off, bb)
    rel = jax.block_until_ready(rel)

    ref = jax.block_until_ready(reference_forward(x, params))
    assert rel.shape == (BATCH, TOTAL_RELATIONS)
    assert np.all(np.isfinite(np.asarray(rel)))
    assert np.allclose(np.asarray(rel), np.asarray(ref), atol=1e-2, rtol=1e-2), (
        f"max abs diff {np.max(np.abs(np.asarray(rel) - np.asarray(ref)))}")

    print("KERNEL_OK")
</pallas_src>

<mosaic_0001>
module attributes {stable_mosaic.version = 11 : i64} {
  func.func @psg_kernel(%arg0: i32, %arg1: memref<16x256xf32, #tpu.memory_space<vmem>>, %arg2: memref<832x128xbf16, #tpu.memory_space<vmem>>, %arg3: memref<40x128xf32, #tpu.memory_space<vmem>>, %arg4: memref<1x2x128xf32, #tpu.memory_space<vmem>>) attributes {dimension_semantics = [#tpu.dimension_semantics<parallel>], iteration_bounds = array<i64: 1>, scalar_prefetch = 0 : i64, scratch_operands = 0 : i64, tpu.core_type = #tpu.core_type<tc>, window_params = [{transform_indices = @transform_0, window_bounds = array<i64: 16, 256>}, {pipeline_mode = #tpu.pipeline_mode<synchronous>, transform_indices = @transform_1, window_bounds = array<i64: 832, 128>}, {pipeline_mode = #tpu.pipeline_mode<synchronous>, transform_indices = @transform_2, window_bounds = array<i64: 40, 128>}, {transform_indices = @transform_3, window_bounds = array<i64: 1, 2, 128>}]} {
    %c0 = arith.constant 0 : index
    %c0_0 = arith.constant 0 : index
    %0 = vector.load %arg1[%c0, %c0_0] : memref<16x256xf32, #tpu.memory_space<vmem>>, vector<16x256xf32>
    %c0_1 = arith.constant 0 : index
    %c0_2 = arith.constant 0 : index
    %1 = vector.load %arg2[%c0_1, %c0_2] : memref<832x128xbf16, #tpu.memory_space<vmem>>, vector<256x32xbf16>
    %2 = arith.truncf %0 : vector<16x256xf32> to vector<16x256xbf16>
    %cst = arith.constant dense<0.000000e+00> : vector<16x32xf32>
    %3 = tpu.matmul %2, %1, %cst {dimension_numbers = #tpu.dot_dimension_numbers<[1], [0], [0], [1], [0, 0, 1, 1], [], []>} : vector<16x256xbf16>, vector<256x32xbf16>, vector<16x32xf32> -> vector<16x32xf32>
    %c0_3 = arith.constant 0 : index
    %c0_4 = arith.constant 0 : index
    %4 = vector.load %arg3[%c0_3, %c0_4] : memref<40x128xf32, #tpu.memory_space<vmem>>, vector<16x32xf32>
    %5 = arith.addf %3, %4 : vector<16x32xf32>
    %c800 = arith.constant 800 : index
    %c0_5 = arith.constant 0 : index
    %6 = vector.load %arg2[%c800, %c0_5] : memref<832x128xbf16, #tpu.memory_space<vmem>>, vector<16x16xbf16>
    %7 = arith.extf %6 : vector<16x16xbf16> to vector<16x16xf32>
    %cst_6 = arith.constant dense<0.000000e+00> : vector<16xf32>
    %8 = vector.multi_reduction <add>, %5, %cst_6 [1] : vector<16x32xf32> to vector<16xf32>
    %9 = vector.shape_cast %8 : vector<16xf32> to vector<16x1xf32>
    %cst_7 = arith.constant 3.200000e+01 : f32
    %10 = vector.broadcast %cst_7 : f32 to vector<16x1xf32>
    %11 = arith.divf %9, %10 : vector<16x1xf32>
    %12 = vector.broadcast %11 : vector<16x1xf32> to vector<16x32xf32>
    %13 = arith.subf %5, %12 : vector<16x32xf32>
    %14 = arith.mulf %13, %13 : vector<16x32xf32>
    %cst_8 = arith.constant dense<0.000000e+00> : vector<16xf32>
    %15 = vector.multi_reduction <add>, %14, %cst_8 [1] : vector<16x32xf32> to vector<16xf32>
    %16 = vector.shape_cast %15 : vector<16xf32> to vector<16x1xf32>
    %cst_9 = arith.constant 3.200000e+01 : f32
    %17 = vector.broadcast %cst_9 : f32 to vector<16x1xf32>
    %18 = arith.divf %16, %17 : vector<16x1xf32>
    %19 = vector.broadcast %11 : vector<16x1xf32> to vector<16x32xf32>
    %20 = arith.subf %5, %19 : vector<16x32xf32>
    %cst_10 = arith.constant 9.99999974E-6 : f32
    %21 = vector.broadcast %cst_10 : f32 to vector<16x1xf32>
    %22 = arith.addf %18, %21 : vector<16x1xf32>
    %23 = math.rsqrt %22 : vector<16x1xf32>
    %24 = vector.broadcast %23 : vector<16x1xf32> to vector<16x32xf32>
    %25 = arith.mulf %20, %24 : vector<16x32xf32>
    %c256 = arith.constant 256 : index
    %c0_11 = arith.constant 0 : index
    %26 = vector.load %arg2[%c256, %c0_11] : memref<832x128xbf16, #tpu.memory_space<vmem>>, vector<32x32xbf16>
    %27 = arith.truncf %25 : vector<16x32xf32> to vector<16x32xbf16>
    %cst_12 = arith.constant dense<0.000000e+00> : vector<16x32xf32>
    %28 = tpu.matmul %27, %26, %cst_12 {dimension_numbers = #tpu.dot_dimension_numbers<[1], [0], [0], [1], [0, 0, 1, 1], [], []>} : vector<16x32xbf16>, vector<32x32xbf16>, vector<16x32xf32> -> vector<16x32xf32>
    %c16 = arith.constant 16 : index
    %c0_13 = arith.constant 0 : index
    %29 = vector.load %arg3[%c16, %c0_13] : memref<40x128xf32, #tpu.memory_space<vmem>>, vector<1x32xf32>
    %30 = vector.broadcast %29 : vector<1x32xf32> to vector<16x32xf32>
    %31 = arith.addf %28, %30 : vector<16x32xf32>
    %c288 = arith.constant 288 : index
    %c0_14 = arith.constant 0 : index
    %32 = vector.load %arg2[%c288, %c0_14] : memref<832x128xbf16, #tpu.memory_space<vmem>>, vector<32x32xbf16>
    %33 = arith.truncf %25 : vector<16x32xf32> to vector<16x32xbf16>
    %cst_15 = arith.constant dense<0.000000e+00> : vector<16x32xf32>
    %34 = tpu.matmul %33, %32, %cst_15 {dimension_numbers = #tpu.dot_dimension_numbers<[1], [0], [0], [1], [0, 0, 1, 1], [], []>} : vector<16x32xbf16>, vector<32x32xbf16>, vector<16x32xf32> -> vector<16x32xf32>
    %c17 = arith.constant 17 : index
    %c0_16 = arith.constant 0 : index
    %35 = vector.load %arg3[%c17, %c0_16] : memref<40x128xf32, #tpu.memory_space<vmem>>, vector<1x32xf32>
    %36 = vector.broadcast %35 : vector<1x32xf32> to vector<16x32xf32>
    %37 = arith.addf %34, %36 : vector<16x32xf32>
    %c320 = arith.constant 320 : index
    %c0_17 = arith.constant 0 : index
    %38 = vector.load %arg2[%c320, %c0_17] : memref<832x128xbf16, #tpu.memory_space<vmem>>, vector<32x32xbf16>
    %39 = arith.truncf %25 : vector<16x32xf32> to vector<16x32xbf16>
    %cst_18 = arith.constant dense<0.000000e+00> : vector<16x32xf32>
    %40 = tpu.matmul %39, %38, %cst_18 {dimension_numbers = #tpu.dot_dimension_numbers<[1], [0], [0], [1], [0, 0, 1, 1], [], []>} : vector<16x32xbf16>, vector<32x32xbf16>, vector<16x32xf32> -> vector<16x32xf32>
    %c18 = arith.constant 18 : index
    %c0_19 = arith.constant 0 : index
    %41 = vector.load %arg3[%c18, %c0_19] : memref<40x128xf32, #tpu.memory_space<vmem>>, vector<1x32xf32>
    %42 = vector.broadcast %41 : vector<1x32xf32> to vector<16x32xf32>
    %43 = arith.addf %40, %42 : vector<16x32xf32>
    %44 = arith.truncf %31 : vector<16x32xf32> to vector<16x32xbf16>
    %45 = arith.truncf %37 : vector<16x32xf32> to vector<16x32xbf16>
    %cst_20 = arith.constant dense<0.000000e+00> : vector<16x16xf32>
    %46 = tpu.matmul %44, %45, %cst_20 {dimension_numbers = #tpu.dot_dimension_numbers<[1], [1], [0], [0], [0, 0, 1, 0], [], []>} : vector<16x32xbf16>, vector<16x32xbf16>, vector<16x16xf32> -> vector<16x16xf32>
    %47 = arith.addf %46, %7 : vector<16x16xf32>
    %cst_21 = arith.constant dense<0xFF800000> : vector<16xf32>
    %48 = vector.multi_reduction <maximumf>, %47, %cst_21 [1] : vector<16x16xf32> to vector<16xf32>
    %49 = vector.shape_cast %48 : vector<16xf32> to vector<16x1xf32>
    %50 = vector.broadcast %49 : vector<16x1xf32> to vector<16x16xf32>
    %51 = arith.subf %47, %50 : vector<16x16xf32>
    %52 = math.exp %51 : vector<16x16xf32>
    %cst_22 = arith.constant dense<0.000000e+00> : vector<16xf32>
    %53 = vector.multi_reduction <add>, %52, %cst_22 [1] : vector<16x16xf32> to vector<16xf32>
    %54 = vector.shape_cast %53 : vector<16xf32> to vector<16x1xf32>
    %55 = tpu.reciprocal %54 {approx = true} : vector<16x1xf32> -> vector<16x1xf32>
    %56 = vector.broadcast %55 : vector<16x1xf32> to vector<16x16xf32>
    %57 = arith.mulf %52, %56 : vector<16x16xf32>
    %cst_23 = arith.constant dense<0.000000e+00> : vector<16x32xf32>
    %58 = tpu.matmul %57, %43, %cst_23 {dimension_numbers = #tpu.dot_dimension_numbers<[1], [0], [0], [1], [0, 0, 1, 1], [], []>} : vector<16x16xf32>, vector<16x32xf32>, vector<16x32xf32> -> vector<16x32xf32>
    %c352 = arith.constant 352 : index
    %c0_24 = arith.constant 0 : index
    %59 = vector.load %arg2[%c352, %c0_24] : memref<832x128xbf16, #tpu.memory_space<vmem>>, vector<32x32xbf16>
    %60 = arith.truncf %58 : vector<16x32xf32> to vector<16x32xbf16>
    %cst_25 = arith.constant dense<0.000000e+00> : vector<16x32xf32>
    %61 = tpu.matmul %60, %59, %cst_25 {dimension_numbers = #tpu.dot_dimension_numbers<[1], [0], [0], [1], [0, 0, 1, 1], [], []>} : vector<16x32xbf16>, vector<32x32xbf16>, vector<16x32xf32> -> vector<16x32xf32>
    %62 = arith.addf %5, %61 : vector<16x32xf32>
    %c19 = arith.constant 19 : index
    %c0_26 = arith.constant 0 : index
    %63 = vector.load %arg3[%c19, %c0_26] : memref<40x128xf32, #tpu.memory_space<vmem>>, vector<1x32xf32>
    %64 = vector.broadcast %63 : vector<1x32xf32> to vector<16x32xf32>
    %65 = arith.addf %62, %64 : vector<16x32xf32>
    %cst_27 = arith.constant dense<0.000000e+00> : vector<16xf32>
    %66 = vector.multi_reduction <add>, %65, %cst_27 [1] : vector<16x32xf32> to vector<16xf32>
    %67 = vector.shape_cast %66 : vector<16xf32> to vector<16x1xf32>
    %cst_28 = arith.constant 3.200000e+01 : f32
    %68 = vector.broadcast %cst_28 : f32 to vector<16x1xf32>
    %69 = arith.divf %67, %68 : vector<16x1xf32>
    %70 = vector.broadcast %69 : vector<16x1xf32> to vector<16x32xf32>
    %71 = arith.subf %65, %70 : vector<16x32xf32>
    %72 = arith.mulf %71, %71 : vector<16x32xf32>
    %cst_29 = arith.constant dense<0.000000e+00> : vector<16xf32>
    %73 = vector.multi_reduction <add>, %72, %cst_29 [1] : vector<16x32xf32> to vector<16xf32>
    %74 = vector.shape_cast %73 : vector<16xf32> to vector<16x1xf32>
    %cst_30 = arith.constant 3.200000e+01 : f32
    %75 = vector.broadcast %cst_30 : f32 to vector<16x1xf32>
    %76 = arith.divf %74, %75 : vector<16x1xf32>
    %77 = vector.broadcast %69 : vector<16x1xf32> to vector<16x32xf32>
    %78 = arith.subf %65, %77 : vector<16x32xf32>
    %cst_31 = arith.constant 9.99999974E-6 : f32
    %79 = vector.broadcast %cst_31 : f32 to vector<16x1xf32>
    %80 = arith.addf %76, %79 : vector<16x1xf32>
    %81 = math.rsqrt %80 : vector<16x1xf32>
    %82 = vector.broadcast %81 : vector<16x1xf32> to vector<16x32xf32>
    %83 = arith.mulf %78, %82 : vector<16x32xf32>
    %c384 = arith.constant 384 : index
    %c0_32 = arith.constant 0 : index
    %84 = vector.load %arg2[%c384, %c0_32] : memref<832x128xbf16, #tpu.memory_space<vmem>>, vector<32x96xbf16>
    %85 = arith.truncf %83 : vector<16x32xf32> to vector<16x32xbf16>
    %cst_33 = arith.constant dense<0.000000e+00> : vector<16x96xf32>
    %86 = tpu.matmul %85, %84, %cst_33 {dimension_numbers = #tpu.dot_dimension_numbers<[1], [0], [0], [1], [0, 0, 1, 1], [], []>} : vector<16x32xbf16>, vector<32x96xbf16>, vector<16x96xf32> -> vector<16x96xf32>
    %c20 = arith.constant 20 : index
    %c0_34 = arith.constant 0 : index
    %87 = vector.load %arg3[%c20, %c0_34] : memref<40x128xf32, #tpu.memory_space<vmem>>, vector<1x96xf32>
    %88 = vector.broadcast %87 : vector<1x96xf32> to vector<16x96xf32>
    %89 = arith.addf %86, %88 : vector<16x96xf32>
    %90 = arith.mulf %89, %89 : vector<16x96xf32>
    %91 = arith.mulf %89, %90 : vector<16x96xf32>
    %cst_35 = arith.constant 4.471500e-02 : f32
    %92 = vector.broadcast %cst_35 : f32 to vector<16x96xf32>
    %93 = arith.mulf %92, %91 : vector<16x96xf32>
    %94 = arith.addf %89, %93 : vector<16x96xf32>
    %cst_36 = arith.constant 0.797884583 : f32
    %95 = vector.broadcast %cst_36 : f32 to vector<16x96xf32>
    %96 = arith.mulf %95, %94 : vector<16x96xf32>
    %97 = math.tanh %96 : vector<16x96xf32>
    %cst_37 = arith.constant 1.000000e+00 : f32
    %98 = vector.broadcast %cst_37 : f32 to vector<16x96xf32>
    %99 = arith.addf %98, %97 : vector<16x96xf32>
    %cst_38 = arith.constant 5.000000e-01 : f32
    %100 = vector.broadcast %cst_38 : f32 to vector<16x96xf32>
    %101 = arith.mulf %100, %99 : vector<16x96xf32>
    %102 = arith.mulf %89, %101 : vector<16x96xf32>
    %c416 = arith.constant 416 : index
    %c0_39 = arith.constant 0 : index
    %103 = vector.load %arg2[%c416, %c0_39] : memref<832x128xbf16, #tpu.memory_space<vmem>>, vector<96x32xbf16>
    %104 = arith.truncf %102 : vector<16x96xf32> to vector<16x96xbf16>
    %cst_40 = arith.constant dense<0.000000e+00> : vector<16x32xf32>
    %105 = tpu.matmul %104, %103, %cst_40 {dimension_numbers = #tpu.dot_dimension_numbers<[1], [0], [0], [1], [0, 0, 1, 1], [], []>} : vector<16x96xbf16>, vector<96x32xbf16>, vector<16x32xf32> -> vector<16x32xf32>
    %106 = arith.addf %65, %105 : vector<16x32xf32>
    %c21 = arith.constant 21 : index
    %c0_41 = arith.constant 0 : index
    %107 = vector.load %arg3[%c21, %c0_41] : memref<40x128xf32, #tpu.memory_space<vmem>>, vector<1x32xf32>
    %108 = vector.broadcast %107 : vector<1x32xf32> to vector<16x32xf32>
    %109 = arith.addf %106, %108 : vector<16x32xf32>
    %cst_42 = arith.constant dense<0.000000e+00> : vector<16xf32>
    %110 = vector.multi_reduction <add>, %109, %cst_42 [1] : vector<16x32xf32> to vector<16xf32>
    %111 = vector.shape_cast %110 : vector<16xf32> to vector<16x1xf32>
    %cst_43 = arith.constant 3.200000e+01 : f32
    %112 = vector.broadcast %cst_43 : f32 to vector<16x1xf32>
    %113 = arith.divf %111, %112 : vector<16x1xf32>
    %114 = vector.broadcast %113 : vector<16x1xf32> to vector<16x32xf32>
    %115 = arith.subf %109, %114 : vector<16x32xf32>
    %116 = arith.mulf %115, %115 : vector<16x32xf32>
    %cst_44 = arith.constant dense<0.000000e+00> : vector<16xf32>
    %117 = vector.multi_reduction <add>, %116, %cst_44 [1] : vector<16x32xf32> to vector<16xf32>
    %118 = vector.shape_cast %117 : vector<16xf32> to vector<16x1xf32>
    %cst_45 = arith.constant 3.200000e+01 : f32
    %119 = vector.broadcast %cst_45 : f32 to vector<16x1xf32>
    %120 = arith.divf %118, %119 : vector<16x1xf32>
    %121 = vector.broadcast %113 : vector<16x1xf32> to vector<16x32xf32>
    %122 = arith.subf %109, %121 : vector<16x32xf32>
    %cst_46 = arith.constant 9.99999974E-6 : f32
    %123 = vector.broadcast %cst_46 : f32 to vector<16x1xf32>
    %124 = arith.addf %120, %123 : vector<16x1xf32>
    %125 = math.rsqrt %124 : vector<16x1xf32>
    %126 = vector.broadcast %125 : vector<16x1xf32> to vector<16x32xf32>
    %127 = arith.mulf %122, %126 : vector<16x32xf32>
    %c512 = arith.constant 512 : index
    %c0_47 = arith.constant 0 : index
    %128 = vector.load %arg2[%c512, %c0_47] : memref<832x128xbf16, #tpu.memory_space<vmem>>, vector<32x32xbf16>
    %129 = arith.truncf %127 : vector<16x32xf32> to vector<16x32xbf16>
    %cst_48 = arith.constant dense<0.000000e+00> : vector<16x32xf32>
    %130 = tpu.matmul %129, %128, %cst_48 {dimension_numbers = #tpu.dot_dimension_numbers<[1], [0], [0], [1], [0, 0, 1, 1], [], []>} : vector<16x32xbf16>, vector<32x32xbf16>, vector<16x32xf32> -> vector<16x32xf32>
    %c24 = arith.constant 24 : index
    %c0_49 = arith.constant 0 : index
    %131 = vector.load %arg3[%c24, %c0_49] : memref<40x128xf32, #tpu.memory_space<vmem>>, vector<1x32xf32>
    %132 = vector.broadcast %131 : vector<1x32xf32> to vector<16x32xf32>
    %133 = arith.addf %130, %132 : vector<16x32xf32>
    %c544 = arith.constant 544 : index
    %c0_50 = arith.constant 0 : index
    %134 = vector.load %arg2[%c544, %c0_50] : memref<832x128xbf16, #tpu.memory_space<vmem>>, vector<32x32xbf16>
    %135 = arith.truncf %127 : vector<16x32xf32> to vector<16x32xbf16>
    %cst_51 = arith.constant dense<0.000000e+00> : vector<16x32xf32>
    %136 = tpu.matmul %135, %134, %cst_51 {dimension_numbers = #tpu.dot_dimension_numbers<[1], [0], [0], [1], [0, 0, 1, 1], [], []>} : vector<16x32xbf16>, vector<32x32xbf16>, vector<16x32xf32> -> vector<16x32xf32>
    %c25 = arith.constant 25 : index
    %c0_52 = arith.constant 0 : index
    %137 = vector.load %arg3[%c25, %c0_52] : memref<40x128xf32, #tpu.memory_space<vmem>>, vector<1x32xf32>
    %138 = vector.broadcast %137 : vector<1x32xf32> to vector<16x32xf32>
    %139 = arith.addf %136, %138 : vector<16x32xf32>
    %c576 = arith.constant 576 : index
    %c0_53 = arith.constant 0 : index
    %140 = vector.load %arg2[%c576, %c0_53] : memref<832x128xbf16, #tpu.memory_space<vmem>>, vector<32x32xbf16>
    %141 = arith.truncf %127 : vector<16x32xf32> to vector<16x32xbf16>
    %cst_54 = arith.constant dense<0.000000e+00> : vector<16x32xf32>
    %142 = tpu.matmul %141, %140, %cst_54 {dimension_numbers = #tpu.dot_dimension_numbers<[1], [0], [0], [1], [0, 0, 1, 1], [], []>} : vector<16x32xbf16>, vector<32x32xbf16>, vector<16x32xf32> -> vector<16x32xf32>
    %c26 = arith.constant 26 : index
    %c0_55 = arith.constant 0 : index
    %143 = vector.load %arg3[%c26, %c0_55] : memref<40x128xf32, #tpu.memory_space<vmem>>, vector<1x32xf32>
    %144 = vector.broadcast %143 : vector<1x32xf32> to vector<16x32xf32>
    %145 = arith.addf %142, %144 : vector<16x32xf32>
    %146 = arith.truncf %133 : vector<16x32xf32> to vector<16x32xbf16>
    %147 = arith.truncf %139 : vector<16x32xf32> to vector<16x32xbf16>
    %cst_56 = arith.constant dense<0.000000e+00> : vector<16x16xf32>
    %148 = tpu.matmul %146, %147, %cst_56 {dimension_numbers = #tpu.dot_dimension_numbers<[1], [1], [0], [0], [0, 0, 1, 0], [], []>} : vector<16x32xbf16>, vector<16x32xbf16>, vector<16x16xf32> -> vector<16x16xf32>
    %149 = arith.addf %148, %7 : vector<16x16xf32>
    %cst_57 = arith.constant dense<0xFF800000> : vector<16xf32>
    %150 = vector.multi_reduction <maximumf>, %149, %cst_57 [1] : vector<16x16xf32> to vector<16xf32>
    %151 = vector.shape_cast %150 : vector<16xf32> to vector<16x1xf32>
    %152 = vector.broadcast %151 : vector<16x1xf32> to vector<16x16xf32>
    %153 = arith.subf %149, %152 : vector<16x16xf32>
    %154 = math.exp %153 : vector<16x16xf32>
    %cst_58 = arith.constant dense<0.000000e+00> : vector<16xf32>
    %155 = vector.multi_reduction <add>, %154, %cst_58 [1] : vector<16x16xf32> to vector<16xf32>
    %156 = vector.shape_cast %155 : vector<16xf32> to vector<16x1xf32>
    %157 = tpu.reciprocal %156 {approx = true} : vector<16x1xf32> -> vector<16x1xf32>
    %158 = vector.broadcast %157 : vector<16x1xf32> to vector<16x16xf32>
    %159 = arith.mulf %154, %158 : vector<16x16xf32>
    %cst_59 = arith.constant dense<0.000000e+00> : vector<16x32xf32>
    %160 = tpu.matmul %159, %145, %cst_59 {dimension_numbers = #tpu.dot_dimension_numbers<[1], [0], [0], [1], [0, 0, 1, 1], [], []>} : vector<16x16xf32>, vector<16x32xf32>, vector<16x32xf32> -> vector<16x32xf32>
    %c608 = arith.constant 608 : index
    %c0_60 = arith.constant 0 : index
    %161 = vector.load %arg2[%c608, %c0_60] : memref<832x128xbf16, #tpu.memory_space<vmem>>, vector<32x32xbf16>
    %162 = arith.truncf %160 : vector<16x32xf32> to vector<16x32xbf16>
    %cst_61 = arith.constant dense<0.000000e+00> : vector<16x32xf32>
    %163 = tpu.matmul %162, %161, %cst_61 {dimension_numbers = #tpu.dot_dimension_numbers<[1], [0], [0], [1], [0, 0, 1, 1], [], []>} : vector<16x32xbf16>, vector<32x32xbf16>, vector<16x32xf32> -> vector<16x32xf32>
    %164 = arith.addf %109, %163 : vector<16x32xf32>
    %c27 = arith.constant 27 : index
    %c0_62 = arith.constant 0 : index
    %165 = vector.load %arg3[%c27, %c0_62] : memref<40x128xf32, #tpu.memory_space<vmem>>, vector<1x32xf32>
    %166 = vector.broadcast %165 : vector<1x32xf32> to vector<16x32xf32>
    %167 = arith.addf %164, %166 : vector<16x32xf32>
    %cst_63 = arith.constant dense<0.000000e+00> : vector<16xf32>
    %168 = vector.multi_reduction <add>, %167, %cst_63 [1] : vector<16x32xf32> to vector<16xf32>
    %169 = vector.shape_cast %168 : vector<16xf32> to vector<16x1xf32>
    %cst_64 = arith.constant 3.200000e+01 : f32
    %170 = vector.broadcast %cst_64 : f32 to vector<16x1xf32>
    %171 = arith.divf %169, %170 : vector<16x1xf32>
    %172 = vector.broadcast %171 : vector<16x1xf32> to vector<16x32xf32>
    %173 = arith.subf %167, %172 : vector<16x32xf32>
    %174 = arith.mulf %173, %173 : vector<16x32xf32>
    %cst_65 = arith.constant dense<0.000000e+00> : vector<16xf32>
    %175 = vector.multi_reduction <add>, %174, %cst_65 [1] : vector<16x32xf32> to vector<16xf32>
    %176 = vector.shape_cast %175 : vector<16xf32> to vector<16x1xf32>
    %cst_66 = arith.constant 3.200000e+01 : f32
    %177 = vector.broadcast %cst_66 : f32 to vector<16x1xf32>
    %178 = arith.divf %176, %177 : vector<16x1xf32>
    %179 = vector.broadcast %171 : vector<16x1xf32> to vector<16x32xf32>
    %180 = arith.subf %167, %179 : vector<16x32xf32>
    %cst_67 = arith.constant 9.99999974E-6 : f32
    %181 = vector.broadcast %cst_67 : f32 to vector<16x1xf32>
    %182 = arith.addf %178, %181 : vector<16x1xf32>
    %183 = math.rsqrt %182 : vector<16x1xf32>
    %184 = vector.broadcast %183 : vector<16x1xf32> to vector<16x32xf32>
    %185 = arith.mulf %180, %184 : vector<16x32xf32>
    %c640 = arith.constant 640 : index
    %c0_68 = arith.constant 0 : index
    %186 = vector.load %arg2[%c640, %c0_68] : memref<832x128xbf16, #tpu.memory_space<vmem>>, vector<32x96xbf16>
    %187 = arith.truncf %185 : vector<16x32xf32> to vector<16x32xbf16>
    %cst_69 = arith.constant dense<0.000000e+00> : vector<16x96xf32>
    %188 = tpu.matmul %187, %186, %cst_69 {dimension_numbers = #tpu.dot_dimension_numbers<[1], [0], [0], [1], [0, 0, 1, 1], [], []>} : vector<16x32xbf16>, vector<32x96xbf16>, vector<16x96xf32> -> vector<16x96xf32>
    %c28 = arith.constant 28 : index
    %c0_70 = arith.constant 0 : index
    %189 = vector.load %arg3[%c28, %c0_70] : memref<40x128xf32, #tpu.memory_space<vmem>>, vector<1x96xf32>
    %190 = vector.broadcast %189 : vector<1x96xf32> to vector<16x96xf32>
    %191 = arith.addf %188, %190 : vector<16x96xf32>
    %192 = arith.mulf %191, %191 : vector<16x96xf32>
    %193 = arith.mulf %191, %192 : vector<16x96xf32>
    %cst_71 = arith.constant 4.471500e-02 : f32
    %194 = vector.broadcast %cst_71 : f32 to vector<16x96xf32>
    %195 = arith.mulf %194, %193 : vector<16x96xf32>
    %196 = arith.addf %191, %195 : vector<16x96xf32>
    %cst_72 = arith.constant 0.797884583 : f32
    %197 = vector.broadcast %cst_72 : f32 to vector<16x96xf32>
    %198 = arith.mulf %197, %196 : vector<16x96xf32>
    %199 = math.tanh %198 : vector<16x96xf32>
    %cst_73 = arith.constant 1.000000e+00 : f32
    %200 = vector.broadcast %cst_73 : f32 to vector<16x96xf32>
    %201 = arith.addf %200, %199 : vector<16x96xf32>
    %cst_74 = arith.constant 5.000000e-01 : f32
    %202 = vector.broadcast %cst_74 : f32 to vector<16x96xf32>
    %203 = arith.mulf %202, %201 : vector<16x96xf32>
    %204 = arith.mulf %191, %203 : vector<16x96xf32>
    %c672 = arith.constant 672 : index
    %c0_75 = arith.constant 0 : index
    %205 = vector.load %arg2[%c672, %c0_75] : memref<832x128xbf16, #tpu.memory_space<vmem>>, vector<96x32xbf16>
    %206 = arith.truncf %204 : vector<16x96xf32> to vector<16x96xbf16>
    %cst_76 = arith.constant dense<0.000000e+00> : vector<16x32xf32>
    %207 = tpu.matmul %206, %205, %cst_76 {dimension_numbers = #tpu.dot_dimension_numbers<[1], [0], [0], [1], [0, 0, 1, 1], [], []>} : vector<16x96xbf16>, vector<96x32xbf16>, vector<16x32xf32> -> vector<16x32xf32>
    %208 = arith.addf %167, %207 : vector<16x32xf32>
    %c29 = arith.constant 29 : index
    %c0_77 = arith.constant 0 : index
    %209 = vector.load %arg3[%c29, %c0_77] : memref<40x128xf32, #tpu.memory_space<vmem>>, vector<1x32xf32>
    %210 = vector.broadcast %209 : vector<1x32xf32> to vector<16x32xf32>
    %211 = arith.addf %208, %210 : vector<16x32xf32>
    %cst_78 = arith.constant dense<0.000000e+00> : vector<16xf32>
    %212 = vector.multi_reduction <add>, %211, %cst_78 [1] : vector<16x32xf32> to vector<16xf32>
    %213 = vector.shape_cast %212 : vector<16xf32> to vector<16x1xf32>
    %cst_79 = arith.constant 3.200000e+01 : f32
    %214 = vector.broadcast %cst_79 : f32 to vector<16x1xf32>
    %215 = arith.divf %213, %214 : vector<16x1xf32>
    %216 = vector.broadcast %215 : vector<16x1xf32> to vector<16x32xf32>
    %217 = arith.subf %211, %216 : vector<16x32xf32>
    %218 = arith.mulf %217, %217 : vector<16x32xf32>
    %cst_80 = arith.constant dense<0.000000e+00> : vector<16xf32>
    %219 = vector.multi_reduction <add>, %218, %cst_80 [1] : vector<16x32xf32> to vector<16xf32>
    %220 = vector.shape_cast %219 : vector<16xf32> to vector<16x1xf32>
    %cst_81 = arith.constant 3.200000e+01 : f32
    %221 = vector.broadcast %cst_81 : f32 to vector<16x1xf32>
    %222 = arith.divf %220, %221 : vector<16x1xf32>
    %223 = vector.broadcast %215 : vector<16x1xf32> to vector<16x32xf32>
    %224 = arith.subf %211, %223 : vector<16x32xf32>
    %cst_82 = arith.constant 9.99999974E-6 : f32
    %225 = vector.broadcast %cst_82 : f32 to vector<16x1xf32>
    %226 = arith.addf %222, %225 : vector<16x1xf32>
    %227 = math.rsqrt %226 : vector<16x1xf32>
    %228 = vector.broadcast %227 : vector<16x1xf32> to vector<16x32xf32>
    %229 = arith.mulf %224, %228 : vector<16x32xf32>
    %c816 = arith.constant 816 : index
    %c0_83 = arith.constant 0 : index
    %230 = vector.load %arg2[%c816, %c0_83] : memref<832x128xbf16, #tpu.memory_space<vmem>>, vector<2x16xbf16>
    %231 = arith.truncf %229 : vector<16x32xf32> to vector<16x32xbf16>
    %cst_84 = arith.constant dense<0.000000e+00> : vector<2x32xf32>
    %232 = tpu.matmul %230, %231, %cst_84 {dimension_numbers = #tpu.dot_dimension_numbers<[1], [0], [0], [1], [0, 0, 1, 1], [], []>} : vector<2x16xbf16>, vector<16x32xbf16>, vector<2x32xf32> -> vector<2x32xf32>
    %233 = arith.truncf %232 : vector<2x32xf32> to vector<2x32xbf16>
    %c768 = arith.constant 768 : index
    %c0_85 = arith.constant 0 : index
    %234 = vector.load %arg2[%c768, %c0_85] : memref<832x128xbf16, #tpu.memory_space<vmem>>, vector<32x128xbf16>
    %cst_86 = arith.constant dense<0.000000e+00> : vector<2x128xf32>
    %235 = tpu.matmul %233, %234, %cst_86 {dimension_numbers = #tpu.dot_dimension_numbers<[1], [0], [0], [1], [0, 0, 1, 1], [], []>} : vector<2x32xbf16>, vector<32x128xbf16>, vector<2x128xf32> -> vector<2x128xf32>
    %c32 = arith.constant 32 : index
    %c0_87 = arith.constant 0 : index
    %236 = vector.load %arg3[%c32, %c0_87] : memref<40x128xf32, #tpu.memory_space<vmem>>, vector<1x128xf32>
    %237 = vector.broadcast %236 : vector<1x128xf32> to vector<2x128xf32>
    %238 = arith.addf %235, %237 : vector<2x128xf32>
    %c0_88 = arith.constant 0 : index
    %c0_89 = arith.constant 0 : index
    %c0_90 = arith.constant 0 : index
    %239 = vector.load %arg4[%c0_88, %c0_89, %c0_90] : memref<1x2x128xf32, #tpu.memory_space<vmem>>, vector<1x2x128xf32>
    %240 = vector.shape_cast %239 : vector<1x2x128xf32> to vector<2x128xf32>
    %241 = vector.shape_cast %238 : vector<2x128xf32> to vector<1x2x128xf32>
    tpu.vector_store %arg4[%c0_88, %c0_89, %c0_90], %241 {strides = array<i32>} : memref<1x2x128xf32, #tpu.memory_space<vmem>>, vector<1x2x128xf32>,
    return
  }
  func.func @transform_0(%arg0: i32) -> (i32, i32) {
    %c0_i32 = arith.constant 0 : i32
    %c0_i32_0 = arith.constant 0 : i32
    return %arg0, %c0_i32 : i32, i32
  }
  func.func @transform_1(%arg0: i32) -> (i32, i32) {
    %c0_i32 = arith.constant 0 : i32
    %c0_i32_0 = arith.constant 0 : i32
    %c0_i32_1 = arith.constant 0 : i32
    return %c0_i32, %c0_i32_0 : i32, i32
  }
  func.func @transform_2(%arg0: i32) -> (i32, i32) {
    %c0_i32 = arith.constant 0 : i32
    %c0_i32_0 = arith.constant 0 : i32
    %c0_i32_1 = arith.constant 0 : i32
    return %c0_i32, %c0_i32_0 : i32, i32
  }
  func.func @transform_3(%arg0: i32) -> (i32, i32, i32) {
    %c0_i32 = arith.constant 0 : i32
    %c0_i32_0 = arith.constant 0 : i32
    %c0_i32_1 = arith.constant 0 : i32
    return %arg0, %c0_i32, %c0_i32_0 : i32, i32, i32
  }
}

</mosaic_0001>

<bundles_post_ra>
// kernel: tpu_custom_call.1
= control target key start
LH: loop header
LB: loop body
LE: loop exit
PB: predicated region body
PF: predicated region fallthrough
CT: control target
= control target key end

     0   :  { %8 = vsyncpa [#allocation3], 0  ;;  %s1825_s0 = inlined_call_operand.hbm [shape: f32[16,256], index: 0, kind: input, shape index: {}]   ;;  %s1826_s1 = inlined_call_operand.hbm [shape: bf16[832,128], index: 1, kind: input, shape index: {}]   ;;  %s1827_s2 = inlined_call_operand.hbm [shape: f32[40,128], index: 2, kind: input, shape index: {}]   ;;  %s1828_s3 = inlined_call_operand.hbm [shape: f32[1,2,128], index: 3, kind: output, shape index: {}]  }
   0x1   :  { %9 = vsyncpa [#allocation6], 0  ;;  %s28_s14 = sshll.u32 %s1826_s1, 4  ;;  %s29_s14 = int_to_ptr.hbm [resolvable:$true] %s28_s14 }
   0x2   :  { %10 = vsyncpa [#allocation4], 0  ;;  %s1658_s15 = smov [#allocation5]   ;;  %s15_s19 = sshll.u32 %s1825_s0, 4  ;;  %s16_s19 = int_to_ptr.hbm [resolvable:$true] %s15_s19 }
   0x3   :  { %s30_s16 = sshll.u32 %s1658_s15, 4  ;;  %s1659_s20 = smov 64   ;;  %s31_s16 = int_to_ptr.vmem [resolvable:$true] %s30_s16 }
   0x4   :  { %s1660_s21 = smov 4   ;;  %s1661_s22 = smov [#allocation2]  }
   0x5   :  { %36 = dma.hbm_to_vmem [thread:$0]  %s29_s14, 6656, %s31_s16, [#allocation6], %s1659_s20, %s1659_s20, %s1660_s21  }
   0x6   :  { %s17_s23 = sshll.u32 %s1661_s22, 4  ;;  %s1662_s24 = smov 256   ;;  %s18_s23 = int_to_ptr.vmem [resolvable:$true] %s17_s23 }
   0x7   :  { %s1663_s25 = smov 16   ;;  %s41_s27 = sshll.u32 %s1827_s2, 4  ;;  %s42_s27 = int_to_ptr.hbm [resolvable:$true] %s41_s27 }
   0x8   :  { %23 = dma.hbm_to_vmem [thread:$0]  %s16_s19, 512, %s18_s23, [#allocation3], %s1662_s24, %s1662_s24, %s1663_s25  }
   0x9   :  { %s1664_s28 = smov [#allocation7]   ;;  %s1665_s30 = smov 128  }
   0xa   :  { %s43_s29 = sshll.u32 %s1664_s28, 4  ;;  %s1666_s0 = smov 8   ;;  %s44_s29 = int_to_ptr.vmem [resolvable:$true] %s43_s29 }
   0xb   :  { %49 = dma.hbm_to_vmem [thread:$0]  %s42_s27, 640, %s44_s29, [#allocation6], %s1665_s30, %s1665_s30, %s1666_s0  }
   0xc   :  { %1652 = dma.done.wait [#allocation3], 512  }
   0xd   :  { %1653 = vsyncadd [#allocation3], 4294966784 }
   0xe   :  { %1654 = dma.done.wait [#allocation6], 7296  }
   0xf   :  { %1655 = vsyncadd [#allocation6], 4294960000  ;;  %v1438_v0 = vld [vmem:[#allocation5 + $0x38] sm:$0xff]  ;;  %v1437_v2 = vld [vmem:[#allocation5 + $0x30] sm:$0xff]  ;;  %vm231_vm0 = vcmask 261120   ;;  %v1667_v34 = vmov 32.0  }
  0x10   :  { %v1446_v1 = vld [vmem:[#allocation5 + $0x78] sm:$0xff]  ;;  %199 = vmatpush.bf16.msra.mxu0 %v1438_v0  ;;  %v1445_v3 = vld [vmem:[#allocation5 + $0x70] sm:$0xff]  ;;  %v1436_v4 = vld [vmem:[#allocation5 + $0x28] sm:$0xff]  ;;  %1510 = vrcp.f32 %v1667_v34  ;;  %vm405_vm8 = vcmask 130048   ;;  %vm644_vm15 = vcmask 785408   ;;  %s1668_s2 = smov [#allocation8]  }
  0x11   :  { %213 = vmatpush.bf16.msra.mxu1 %v1446_v1  ;;  %v1444_v5 = vld [vmem:[#allocation5 + $0x68] sm:$0xff]  ;;  %v1435_v6 = vld [vmem:[#allocation5 + $0x20] sm:$0xff]  ;;  %v1434_v8 = vld [vmem:[#allocation5 + $0x18] sm:$0xff]  ;;  %s1198_s4 = sshll.u32 %s1668_s2, 4  ;;  %s1200_s7 = sshll.u32 %s1828_s3, 4  ;;  %s1199_s4 = int_to_ptr.vmem [resolvable:$true] %s1198_s4  ;;  %s1201_s7 = int_to_ptr.hbm [resolvable:$true] %s1200_s7 }
  0x12   :  { %v1443_v7 = vld [vmem:[#allocation5 + $0x60] sm:$0xff]  ;;  %v1442_v9 = vld [vmem:[#allocation5 + $0x58] sm:$0xff]  ;;  %v1433_v10 = vld [vmem:[#allocation5 + $0x10] sm:$0xff] }
  0x13   :  { %v1441_v11 = vld [vmem:[#allocation5 + $0x50] sm:$0xff]  ;;  %v1432_v12 = vld [vmem:[#allocation5 + $0x8] sm:$0xff]  ;;  %v1431_v14 = vld [vmem:[#allocation5] sm:$0xff] }
  0x14   :  { %200 = vmatpush.bf16.msra.mxu0 %v1437_v2  ;;  %v1440_v13 = vld [vmem:[#allocation5 + $0x48] sm:$0xff]  ;;  %v1439_v15 = vld [vmem:[#allocation5 + $0x40] sm:$0xff]  ;;  %v65_v17 = vld [vmem:[#allocation2 + $0x10] sm:$0xff] }
  0x15   :  { %214 = vmatpush.bf16.msra.mxu1 %v1445_v3  ;;  %v63_v16 = vld [vmem:[#allocation2] sm:$0xff]  ;;  %v64_v18 = vld [vmem:[#allocation2 + $0x8] sm:$0xff]  ;;  %v66_v19 = vld [vmem:[#allocation2 + $0x18] sm:$0xff] }
  0x16   :  { %v99_v20 = vpack.c.bf16 %v65_v17, %v63_v16  ;;  %v100_v21 = vpack.c.bf16 %v66_v19, %v64_v18  ;;  %v101_v22 = vld [vmem:[#allocation7] sm:$0xff]  ;;  %v102_v28 = vld [vmem:[#allocation7 + $0x8] sm:$0xff]  ;;  %v1511_v35 = vpop.eup %1510  ;;  %v1450_v52 = vld [vmem:[#allocation5 + $0x98] sm:$0xff] }
  0x17   :  { %v239_v36 = vmul.f32 32.0, %v1511_v35  ;;  %vm243_vm1 = vweird.f32 %v1511_v35  ;;  %v1448_v51 = vld [vmem:[#allocation5 + $0x88] sm:$0xff]  ;;  %343 = vmatpush.bf16.msra.mxu3 %v1450_v52  ;;  %v1447_v53 = vld [vmem:[#allocation5 + $0x80] sm:$0xff]  ;;  %v1449_v54 = vld [vmem:[#allocation5 + $0x90] sm:$0xff] }
  0x18   :  { %201 = vmatpush.bf16.msra.mxu0 %v1436_v4  ;;  %311 = vmatpush.bf16.msra.mxu2 %v1448_v51  ;;  %v1452_v58 = vld [vmem:[#allocation5 + $0xa8] sm:$0xff]  ;;  %v1451_v59 = vld [vmem:[#allocation5 + $0xa0] sm:$0xff]  ;;  %v1498_v18 = vld [vmem:[#allocation7 + $0x11] ss:$0 sm:$0xff] }
  0x19   :  { %215 = vmatpush.bf16.msra.mxu1 %v1444_v5  ;;  %v240_v37 = vsub.f32 1.0, %v239_v36  ;;  %v1721_v36 = vld [vmem:[#allocation5 + $0x190] sm:$0xff]  }
  0x1b   :  { %v241_v38 = vmul.f32 %v1511_v35, %v240_v37  ;;  %344 = vmatpush.bf16.msra.mxu3 %v1449_v54  ;;  %v1483_v37 = vunpack.c.l.bf16 %v1721_v36 }
  0x1c   :  { %202 = vmatpush.bf16.msra.mxu0 %v1435_v6  ;;  %312 = vmatpush.bf16.msra.mxu2 %v1447_v53 }
  0x1d   :  { %216 = vmatpush.bf16.msra.mxu1 %v1443_v7  ;;  %v242_v39 = vadd.f32 %v1511_v35, %v241_v38 }
  0x1f   :  { %v1706_v40 = vsel %vm243_vm1, %v1511_v35, %v242_v39 }
  0x20   :  { %203 = vmatpush.bf16.msra.mxu0 %v1434_v8  ;;  %375 = vmatpush.bf16.msrb.mxu2 %v1452_v58 }
  0x21   :  { %217 = vmatpush.bf16.msra.mxu1 %v1442_v9 }
  0x24   :  { %204 = vmatpush.bf16.msra.mxu0 %v1433_v10  ;;  %376 = vmatpush.bf16.msrb.mxu2 %v1451_v59 }
  0x25   :  { %218 = vmatpush.bf16.msra.mxu1 %v1441_v11 }
  0x28   :  { %205 = vmatpush.bf16.msra.mxu0 %v1432_v12 }
  0x29   :  { %219 = vmatpush.bf16.msra.mxu1 %v1440_v13 }
  0x2c   :  { %206 = vmatpush.bf16.msra.mxu0 %v1431_v14 }
  0x2d   :  { %220 = vmatpush.bf16.msra.mxu1 %v1439_v15 }
  0x2f   :  { %207 = vmatmul.bf16.vlgmr.msra.gmra.mxu0 %v99_v20 }
  0x30   :  { %221 = vmatmul.bf16.vlgmr.msra.gmra.mxu1 %v100_v21 }
  0xac   :  { %v208_v23 = vpop.f32.mrf.mxu0 }
  0xad   :  { %v222_v24 = vpop.f32.mrf.mxu1  ;;  %v209_v25 = vadd.f32 %v208_v23, %v101_v22 }
  0xaf   :  { %v1698_v26 = vadd.f32 %v222_v24, %v209_v25  ;;  %v1497_v24 = vld [vmem:[#allocation7 + $0x10] ss:$0 sm:$0xff] }
  0xb1   :  { %v232_v27 = vsel %vm231_vm0, %v1698_v26, 0.0 }
  0xb2   :  { %233 = vadd.xlane.f32.xlu0 %v232_v27 }
  0xb4   :  { %v210_v29 = vpop.f32.mrf.mxu0 }
  0xb5   :  { %v211_v30 = vadd.f32 %v210_v29, %v102_v28  ;;  %v224_v31 = vpop.f32.mrf.mxu1 }
  0xb7   :  { %v1702_v32 = vadd.f32 %v224_v31, %v211_v30  ;;  %v1499_v31 = vld [vmem:[#allocation7 + $0x12] ss:$0 sm:$0xff] }
  0xb9   :  { %v235_v33 = vsel %vm231_vm0, %v1702_v32, 0.0 }
  0xba   :  { %236 = vadd.xlane.f32.xlu0 %v235_v33 }
 0x125   :  { %v234_v41 = vpop.xlane.xlu0 %233 }
 0x126   :  { %v245_v42 = vmul.f32 %v1706_v40, %v234_v41 }
 0x128   :  { %v247_v43 = vsub.f32 %v1698_v26, %v245_v42  ;;  %v1484_v42 = vunpack.c.h.bf16 %v1721_v36 }
 0x12a   :  { %v249_v44 = vmul.f32 %v247_v43, %v247_v43 }
 0x12c   :  { %v251_v45 = vsel %vm231_vm0, %v249_v44, 0.0 }
 0x12d   :  { %252 = vadd.xlane.f32.xlu1 %v251_v45  ;;  %v237_v46 = vpop.xlane.xlu0 %236 }
 0x12e   :  { %v246_v47 = vmul.f32 %v1706_v40, %v237_v46 }
 0x130   :  { %v248_v48 = vsub.f32 %v1702_v32, %v246_v47 }
 0x132   :  { %v250_v49 = vmul.f32 %v248_v48, %v248_v48 }
 0x134   :  { %v254_v50 = vsel %vm231_vm0, %v250_v49, 0.0 }
 0x135   :  { %255 = vadd.xlane.f32.xlu1 %v254_v50 }
 0x1a0   :  { %v253_v55 = vpop.xlane.xlu1 %252 }
 0x1a1   :  { %v257_v56 = vmul.f32 %v253_v55, %v1706_v40 }
 0x1a3   :  { %v259_v57 = vadd.f32 1e-05, %v257_v56 }
 0x1a5   :  { %1512 = vrsqrt.f32 %v259_v57  ;;  %vm267_vm3 = vweird.f32 %v259_v57 }
 0x1a8   :  { %v256_v60 = vpop.xlane.xlu1 %255 }
 0x1a9   :  { %v258_v61 = vmul.f32 %v256_v60, %v1706_v40 }
 0x1ab   :  { %v1513_v62 = vpop.eup %1512  ;;  %v260_v63 = vadd.f32 1e-05, %v258_v61 }
 0x1ac   :  { %v262_v0 = vmul.f32 %v1513_v62, %v259_v57  ;;  %vm268_vm2 = vweird.f32 %v1513_v62 }
 0x1ad   :  { %1514 = vrsqrt.f32 %v260_v63  ;;  %vm269_vm5 = vmor %vm267_vm3, %vm268_vm2  ;;  %vm277_vm6 = vweird.f32 %v260_v63 }
 0x1ae   :  { %v263_v1 = vmul.f32 %v1513_v62, %v262_v0 }
 0x1b0   :  { %v264_v2 = vmul.f32 0.5, %v263_v1 }
 0x1b2   :  { %v265_v4 = vsub.f32 1.5, %v264_v2 }
 0x1b3   :  { %v1515_v3 = vpop.eup %1514 }
 0x1b4   :  { %v272_v5 = vmul.f32 %v1515_v3, %v260_v63  ;;  %v266_v7 = vmul.f32 %v1513_v62, %v265_v4  ;;  %vm278_vm4 = vweird.f32 %v1515_v3  ;;  %v1453_v63 = vld [vmem:[#allocation5 + $0xb0] sm:$0xff] }
 0x1b5   :  { %vm279_vm7 = vmor %vm277_vm6, %vm278_vm4 }
 0x1b6   :  { %v273_v6 = vmul.f32 %v1515_v3, %v272_v5  ;;  %v270_v11 = vsel %vm269_vm5, %v1513_v62, %v266_v7  ;;  %v1454_v62 = vld [vmem:[#allocation5 + $0xb8] sm:$0xff] }
 0x1b7   :  { %v281_v13 = vmul.f32 %v270_v11, %v247_v43 }
 0x1b8   :  { %v274_v8 = vmul.f32 0.5, %v273_v6 }
 0x1ba   :  { %v275_v9 = vsub.f32 1.5, %v274_v8 }
 0x1bc   :  { %v276_v10 = vmul.f32 %v1515_v3, %v275_v9 }
 0x1be   :  { %v280_v12 = vsel %vm279_vm7, %v1515_v3, %v276_v10  ;;  %v1500_v3 = vld [vmem:[#allocation7 + $0x13] ss:$0 sm:$0xff] }
 0x1bf   :  { %v282_v14 = vmul.f32 %v280_v12, %v248_v48 }
 0x1c1   :  { %v287_v15 = vpack.c.bf16 %v282_v14, %v281_v13 }
 0x1c3   :  { %1283 = vmatmul.msk.bf16.vlgmr.msra.gmra.mxu2 %vm231_vm0, %v287_v15  ;;  %1292 = vmatmul.msk.bf16.vlgmr.msra.gmra.mxu3 %vm231_vm0, %v287_v15 }
 0x1d3   :  { %1301 = vmatmul.msk.bf16.vlgmr.msrb.gmra.mxu2 %vm231_vm0, %v287_v15 }
 0x246   :  { %v314_v16 = vpop.f32.mrf.mxu2  ;;  %v346_v17 = vpop.f32.mrf.mxu3 }
 0x247   :  { %v347_v21 = vadd.f32 %v1498_v18, %v346_v17  ;;  %v315_v29 = vadd.f32 %v1497_v24, %v314_v16 }
 0x24e   :  { %v316_v19 = vpop.f32.mrf.mxu2  ;;  %v348_v20 = vpop.f32.mrf.mxu3 }
 0x24f   :  { %v349_v22 = vadd.f32 %v1498_v18, %v348_v20  ;;  %v317_v27 = vadd.f32 %v1497_v24, %v316_v19  ;;  %v1456_v20 = vld [vmem:[#allocation5 + $0xc8] sm:$0xff] }
 0x250   :  { %569 = vmatpush.bf16.msrb.mxu0 %v1456_v20 }
 0x251   :  { %v384_v23 = vpack.c.bf16 %v349_v22, %v347_v21  ;;  %v383_v30 = vpack.c.bf16 %v317_v27, %v315_v29  ;;  %v1455_v21 = vld [vmem:[#allocation5 + $0xc0] sm:$0xff] }
 0x253   :  { %v389_v25 = vsel %vm231_vm0, %v384_v23, 0 }
 0x254   :  { %398 = vmatpush.bf16.xpose.msrb.mxu3 %v389_v25  ;;  %570 = vmatpush.bf16.msrb.mxu0 %v1455_v21 }
 0x256   :  { %v378_v28 = vpop.f32.mrf.mxu2 }
 0x257   :  { %v379_v35 = vadd.f32 %v1499_v31, %v378_v28 }
 0x25b   :  { %1302 = vmatmul.msk.bf16.vlgmr.msrb.gmra.mxu3 %vm231_vm0, %v383_v30 }
 0x25c   :  { %483 = vmatpush.bf16.msra.mxu3 %v1454_v62 }
 0x25e   :  { %v380_v33 = vpop.f32.mrf.mxu2 }
 0x25f   :  { %v381_v34 = vadd.f32 %v1499_v31, %v380_v33 }
 0x260   :  { %484 = vmatpush.bf16.msra.mxu3 %v1453_v63 }
 0x261   :  { %448 = vmatpush.msra.mxu2 %v381_v34 }
 0x263   :  { %449 = vmatpush.msra.mxu2 %v379_v35 }
 0x2de   :  { %v400_v38 = vpop.f32.mrf.mxu3 }
 0x2df   :  { %v401_v39 = vadd.f32 %v1483_v37, %v400_v38 }
 0x2e1   :  { %v406_v41 = vsel %vm405_vm8, %v401_v39, -inf }
 0x2e2   :  { %407 = vmax.xlane.f32.xlu2 %v406_v41 }
 0x2e6   :  { %v402_v43 = vpop.f32.mrf.mxu3 }
 0x2e7   :  { %v403_v44 = vadd.f32 %v1484_v42, %v402_v43 }
 0x2e9   :  { %v409_v45 = vsel %vm405_vm8, %v403_v44, -inf }
 0x2ea   :  { %410 = vmax.xlane.f32.xlu2 %v409_v45 }
 0x355   :  { %v408_v46 = vpop.xlane.xlu2 %407 }
 0x356   :  { %v412_v47 = vsub.f32 %v401_v39, %v408_v46 }
 0x358   :  { %v414_v48 = vmul.f32 1.442695, %v412_v47 }
 0x35a   :  { %1516 = vpow2.f32 %v414_v48 }
 0x35d   :  { %v411_v49 = vpop.xlane.xlu2 %410 }
 0x35e   :  { %v413_v50 = vsub.f32 %v403_v44, %v411_v49 }
 0x360   :  { %v1517_v51 = vpop.eup %1516  ;;  %v416_v52 = vmul.f32 1.442695, %v413_v50 }
 0x361   :  { %v418_v53 = vsel %vm405_vm8, %v1517_v51, 0.0 }
 0x362   :  { %1518 = vpow2.f32 %v416_v52  ;;  %419 = vadd.xlane.f32.xlu0 %v418_v53  ;;  %v1461_v52 = vld [vmem:[#allocation5 + $0xf0] sm:$0xff]  ;;  %v1460_v53 = vld [vmem:[#allocation5 + $0xe8] sm:$0xff] }
 0x368   :  { %v1519_v54 = vpop.eup %1518 }
 0x369   :  { %v421_v55 = vsel %vm405_vm8, %v1519_v54, 0.0 }
 0x36a   :  { %422 = vadd.xlane.f32.xlu1 %v421_v55  ;;  %v1458_v55 = vld [vmem:[#allocation5 + $0xd8] sm:$0xff] }
 0x3d5   :  { %v420_v56 = vpop.xlane.xlu0 %419 }
 0x3d6   :  { %1520 = vrcp.f32 %v420_v56  ;;  %v1501_v56 = vld [vmem:[#allocation7 + $0x14] ss:$0 sm:$0xff] }
 0x3dc   :  { %v1521_v57 = vpop.eup %1520 }
 0x3dd   :  { %v426_v58 = vmul.f32 %v1521_v57, %v1517_v51  ;;  %v423_v59 = vpop.xlane.xlu1 %422  ;;  %v1462_v51 = vld [vmem:[#allocation5 + $0xf8] sm:$0xff]  ;;  %v1457_v57 = vld [vmem:[#allocation5 + $0xd0] sm:$0xff] }
 0x3de   :  { %1522 = vrcp.f32 %v423_v59  ;;  %650 = vmatpush.bf16.msrb.mxu1 %v1462_v51 }
 0x3df   :  { %1303 = vmatmul.msk.f32.vlgmr.msra.gmra.mxu2 %vm405_vm8, %v426_v58 }
 0x3e2   :  { %651 = vmatpush.bf16.msrb.mxu1 %v1461_v52 }
 0x3e4   :  { %v1523_v60 = vpop.eup %1522 }
 0x3e5   :  { %v427_v61 = vmul.f32 %v1523_v60, %v1519_v54  ;;  %v1459_v54 = vld [vmem:[#allocation5 + $0xe0] sm:$0xff] }
 0x3e6   :  { %652 = vmatpush.bf16.msrb.mxu1 %v1460_v53 }
 0x3e7   :  { %1304 = vmatmul.msk.f32.gmra.mxu2 %vm405_vm8, %v427_v61 }
 0x3ea   :  { %653 = vmatpush.bf16.msrb.mxu1 %v1459_v54 }
 0x3ee   :  { %654 = vmatpush.bf16.msrb.mxu1 %v1458_v55 }
 0x3f2   :  { %655 = vmatpush.bf16.msrb.mxu1 %v1457_v57 }
 0x462   :  { %v451_v0 = vpop.f32.mrf.mxu2 }
 0x46a   :  { %v454_v1 = vpop.f32.mrf.mxu2 }
 0x46b   :  { %v461_v2 = vpack.c.bf16 %v454_v1, %v451_v0 }
 0x46d   :  { %1313 = vmatmul.msk.bf16.vlgmr.msra.gmra.mxu3 %vm231_vm0, %v461_v2 }
 0x4f0   :  { %v486_v4 = vpop.f32.mrf.mxu3 }
 0x4f1   :  { %v491_v5 = vadd.f32 %v486_v4, %v1698_v26 }
 0x4f3   :  { %v1737_v6 = vadd.f32 %v1500_v3, %v491_v5 }
 0x4f5   :  { %v497_v7 = vsel %vm231_vm0, %v1737_v6, 0.0 }
 0x4f6   :  { %498 = vadd.xlane.f32.xlu2 %v497_v7 }
 0x4f8   :  { %v488_v8 = vpop.f32.mrf.mxu3 }
 0x4f9   :  { %v492_v9 = vadd.f32 %v488_v8, %v1702_v32 }
 0x4fb   :  { %v1742_v10 = vadd.f32 %v1500_v3, %v492_v9 }
 0x4fd   :  { %v500_v11 = vsel %vm231_vm0, %v1742_v10, 0.0 }
 0x4fe   :  { %501 = vadd.xlane.f32.xlu0 %v500_v11 }
 0x569   :  { %v499_v12 = vpop.xlane.xlu2 %498 }
 0x56a   :  { %v503_v13 = vmul.f32 %v499_v12, %v1706_v40 }
 0x56c   :  { %v505_v26 = vsub.f32 %v1737_v6, %v503_v13 }
 0x56e   :  { %v507_v14 = vmul.f32 %v505_v26, %v505_v26 }
 0x570   :  { %v509_v15 = vsel %vm231_vm0, %v507_v14, 0.0 }
 0x571   :  { %510 = vadd.xlane.f32.xlu1 %v509_v15  ;;  %v502_v16 = vpop.xlane.xlu0 %501 }
 0x572   :  { %v504_v17 = vmul.f32 %v502_v16, %v1706_v40 }
 0x574   :  { %v506_v32 = vsub.f32 %v1742_v10, %v504_v17 }
 0x576   :  { %v508_v18 = vmul.f32 %v506_v32, %v506_v32 }
 0x578   :  { %v512_v19 = vsel %vm231_vm0, %v508_v18, 0.0 }
 0x579   :  { %513 = vadd.xlane.f32.xlu2 %v512_v19 }
 0x5e4   :  { %v511_v22 = vpop.xlane.xlu1 %510 }
 0x5e5   :  { %v515_v23 = vmul.f32 %v511_v22, %v1706_v40 }
 0x5e7   :  { %v517_v24 = vadd.f32 1e-05, %v515_v23 }
 0x5e9   :  { %1524 = vrsqrt.f32 %v517_v24  ;;  %vm525_vm10 = vweird.f32 %v517_v24 }
 0x5ec   :  { %v514_v25 = vpop.xlane.xlu2 %513 }
 0x5ed   :  { %v516_v27 = vmul.f32 %v514_v25, %v1706_v40 }
 0x5ef   :  { %v1525_v28 = vpop.eup %1524  ;;  %v518_v29 = vadd.f32 1e-05, %v516_v27 }
 0x5f0   :  { %v520_v30 = vmul.f32 %v1525_v28, %v517_v24  ;;  %vm526_vm9 = vweird.f32 %v1525_v28 }
 0x5f1   :  { %1526 = vrsqrt.f32 %v518_v29  ;;  %vm527_vm12 = vmor %vm525_vm10, %vm526_vm9  ;;  %vm535_vm13 = vweird.f32 %v518_v29 }
 0x5f2   :  { %v521_v31 = vmul.f32 %v1525_v28, %v520_v30 }
 0x5f4   :  { %v522_v33 = vmul.f32 0.5, %v521_v31 }
 0x5f6   :  { %v523_v35 = vsub.f32 1.5, %v522_v33 }
 0x5f7   :  { %v1527_v34 = vpop.eup %1526 }
 0x5f8   :  { %v530_v38 = vmul.f32 %v1527_v34, %v518_v29  ;;  %v524_v41 = vmul.f32 %v1525_v28, %v523_v35  ;;  %vm536_vm11 = vweird.f32 %v1527_v34 }
 0x5f9   :  { %vm537_vm14 = vmor %vm535_vm13, %vm536_vm11 }
 0x5fa   :  { %v531_v39 = vmul.f32 %v1527_v34, %v530_v38  ;;  %v528_v45 = vsel %vm527_vm12, %v1525_v28, %v524_v41  ;;  %v1464_v38 = vld [vmem:[#allocation5 + $0x108] sm:$0xff] }
 0x5fb   :  { %v539_v48 = vmul.f32 %v528_v45, %v505_v26  ;;  %v1468_v41 = vld [vmem:[#allocation5 + $0x128] sm:$0xff]  ;;  %740 = vmatpush.bf16.msrb.mxu2 %v1464_v38  ;;  %v1467_v45 = vld [vmem:[#allocation5 + $0x120] sm:$0xff] }
 0x5fc   :  { %v532_v43 = vmul.f32 0.5, %v531_v39  ;;  %v1466_v39 = vld [vmem:[#allocation5 + $0x118] sm:$0xff]  ;;  %804 = vmatpush.bf16.msra.mxu0 %v1468_v41 }
 0x5fd   :  { %772 = vmatpush.bf16.msrb.mxu3 %v1466_v39 }
 0x5fe   :  { %v533_v44 = vsub.f32 1.5, %v532_v43  ;;  %v1463_v43 = vld [vmem:[#allocation5 + $0x100] sm:$0xff] }
 0x5ff   :  { %741 = vmatpush.bf16.msrb.mxu2 %v1463_v43 }
 0x600   :  { %v534_v46 = vmul.f32 %v1527_v34, %v533_v44  ;;  %v1465_v44 = vld [vmem:[#allocation5 + $0x110] sm:$0xff]  ;;  %805 = vmatpush.bf16.msra.mxu0 %v1467_v45 }
 0x601   :  { %773 = vmatpush.bf16.msrb.mxu3 %v1465_v44 }
 0x602   :  { %v538_v47 = vsel %vm537_vm14, %v1527_v34, %v534_v46 }
 0x603   :  { %v540_v49 = vmul.f32 %v538_v47, %v506_v32  ;;  %v1502_v32 = vld [vmem:[#allocation7 + $0x15] ss:$0 sm:$0xff] }
 0x605   :  { %v545_v50 = vpack.c.bf16 %v540_v49, %v539_v48 }
 0x607   :  { %1322 = vmatmul.msk.bf16.vlgmr.msrb.gmra.mxu0 %vm231_vm0, %v545_v50 }
 0x684   :  { %v572_v58 = vpop.f32.mrf.mxu0 }
 0x685   :  { %v573_v59 = vadd.f32 %v1501_v56, %v572_v58 }
 0x687   :  { %v577_v60 = vmul.f32 %v573_v59, %v573_v59 }
 0x689   :  { %v579_v61 = vmul.f32 %v577_v60, %v573_v59 }
 0x68b   :  { %v581_v62 = vmul.f32 0.044715, %v579_v61 }
 0x68c   :  { %v574_v63 = vpop.f32.mrf.mxu0 }
 0x68d   :  { %v583_v0 = vadd.f32 %v581_v62, %v573_v59  ;;  %v575_v1 = vadd.f32 %v1501_v56, %v574_v63 }
 0x68f   :  { %v585_v2 = vmul.f32 0.7978846, %v583_v0  ;;  %v578_v3 = vmul.f32 %v575_v1, %v575_v1 }
 0x691   :  { %v580_v4 = vmul.f32 %v578_v3, %v575_v1  ;;  %1528 = vtanh.f32 %v585_v2 }
 0x693   :  { %v582_v5 = vmul.f32 0.044715, %v580_v4 }
 0x695   :  { %v584_v7 = vadd.f32 %v582_v5, %v575_v1 }
 0x697   :  { %v586_v8 = vmul.f32 0.7978846, %v584_v7  ;;  %v1529_v9 = vpop.eup %1528 }
 0x698   :  { %v589_v11 = vadd.f32 1.0, %v1529_v9 }
 0x699   :  { %1530 = vtanh.f32 %v586_v8  ;;  %v1503_v8 = vld [vmem:[#allocation7 + $0x1a] ss:$0 sm:$0xff] }
 0x69a   :  { %v591_v13 = vmul.f32 0.5, %v589_v11 }
 0x69c   :  { %v593_v15 = vmul.f32 %v591_v13, %v573_v59  ;;  %v1505_v13 = vld [vmem:[#allocation7 + $0x19] ss:$0 sm:$0xff] }
 0x69f   :  { %v1531_v12 = vpop.eup %1530 }
 0x6a0   :  { %v590_v26 = vadd.f32 1.0, %v1531_v12 }
 0x6a2   :  { %v592_v14 = vmul.f32 0.5, %v590_v26 }
 0x6a4   :  { %v594_v16 = vmul.f32 %v592_v14, %v575_v1 }
 0x6a6   :  { %v607_v17 = vpack.c.bf16 %v594_v16, %v593_v15 }
 0x6a8   :  { %1347 = vmatmul.msk.bf16.vlgmr.msrb.gmra.mxu1 %vm644_vm15, %v607_v17 }
 0x725   :  { %v657_v18 = vpop.f32.mrf.mxu1 }
 0x726   :  { %v662_v19 = vadd.f32 %v657_v18, %v1737_v6  ;;  %v1504_v18 = vld [vmem:[#allocation7 + $0x18] ss:$0 sm:$0xff] }
 0x728   :  { %v1757_v20 = vadd.f32 %v1502_v32, %v662_v19 }
 0x72a   :  { %v668_v21 = vsel %vm231_vm0, %v1757_v20, 0.0 }
 0x72b   :  { %669 = vadd.xlane.f32.xlu0 %v668_v21 }
 0x72d   :  { %v659_v22 = vpop.f32.mrf.mxu1 }
 0x72e   :  { %v663_v23 = vadd.f32 %v659_v22, %v1742_v10 }
 0x730   :  { %v1762_v24 = vadd.f32 %v1502_v32, %v663_v23 }
 0x732   :  { %v671_v25 = vsel %vm231_vm0, %v1762_v24, 0.0 }
 0x733   :  { %672 = vadd.xlane.f32.xlu1 %v671_v25 }
 0x79e   :  { %v670_v27 = vpop.xlane.xlu0 %669 }
 0x79f   :  { %v674_v28 = vmul.f32 %v670_v27, %v1706_v40 }
 0x7a1   :  { %v676_v6 = vsub.f32 %v1757_v20, %v674_v28 }
 0x7a3   :  { %v678_v29 = vmul.f32 %v676_v6, %v676_v6 }
 0x7a5   :  { %v680_v30 = vsel %vm231_vm0, %v678_v29, 0.0 }
 0x7a6   :  { %681 = vadd.xlane.f32.xlu2 %v680_v30  ;;  %v673_v31 = vpop.xlane.xlu1 %672 }
 0x7a7   :  { %v675_v33 = vmul.f32 %v673_v31, %v1706_v40 }
 0x7a9   :  { %v677_v10 = vsub.f32 %v1762_v24, %v675_v33 }
 0x7ab   :  { %v679_v34 = vmul.f32 %v677_v10, %v677_v10 }
 0x7ad   :  { %v683_v35 = vsel %vm231_vm0, %v679_v34, 0.0 }
 0x7ae   :  { %684 = vadd.xlane.f32.xlu0 %v683_v35 }
 0x819   :  { %v682_v46 = vpop.xlane.xlu2 %681 }
 0x81a   :  { %v686_v47 = vmul.f32 %v682_v46, %v1706_v40 }
 0x81c   :  { %v688_v48 = vadd.f32 1e-05, %v686_v47 }
 0x81e   :  { %1532 = vrsqrt.f32 %v688_v48  ;;  %vm696_vm2 = vweird.f32 %v688_v48 }
 0x821   :  { %v685_v49 = vpop.xlane.xlu0 %684 }
 0x822   :  { %v687_v50 = vmul.f32 %v685_v49, %v1706_v40  ;;  %v1469_v49 = vld [vmem:[#allocation5 + $0x130] sm:$0xff] }
 0x824   :  { %v1533_v51 = vpop.eup %1532  ;;  %v689_v52 = vadd.f32 1e-05, %v687_v50 }
 0x825   :  { %v691_v53 = vmul.f32 %v1533_v51, %v688_v48  ;;  %vm697_vm1 = vweird.f32 %v1533_v51  ;;  %v1470_v48 = vld [vmem:[#allocation5 + $0x138] sm:$0xff] }
 0x826   :  { %1534 = vrsqrt.f32 %v689_v52  ;;  %vm698_vm4 = vmor %vm696_vm2, %vm697_vm1  ;;  %vm706_vm5 = vweird.f32 %v689_v52  ;;  %911 = vmatpush.bf16.msra.mxu3 %v1470_v48 }
 0x827   :  { %v692_v54 = vmul.f32 %v1533_v51, %v691_v53  ;;  %v1506_v53 = vld [vmem:[#allocation7 + $0x1b] ss:$0 sm:$0xff] }
 0x829   :  { %v693_v55 = vmul.f32 0.5, %v692_v54 }
 0x82a   :  { %912 = vmatpush.bf16.msra.mxu3 %v1469_v49 }
 0x82b   :  { %v694_v57 = vsub.f32 1.5, %v693_v55 }
 0x82c   :  { %v1535_v56 = vpop.eup %1534 }
 0x82d   :  { %v701_v58 = vmul.f32 %v1535_v56, %v689_v52  ;;  %v695_v60 = vmul.f32 %v1533_v51, %v694_v57  ;;  %vm707_vm3 = vweird.f32 %v1535_v56 }
 0x82e   :  { %vm708_vm6 = vmor %vm706_vm5, %vm707_vm3 }
 0x82f   :  { %v702_v59 = vmul.f32 %v1535_v56, %v701_v58  ;;  %v699_v63 = vsel %vm698_vm4, %v1533_v51, %v695_v60 }
 0x830   :  { %v710_v2 = vmul.f32 %v699_v63, %v676_v6 }
 0x831   :  { %v703_v61 = vmul.f32 0.5, %v702_v59 }
 0x833   :  { %v704_v62 = vsub.f32 1.5, %v703_v61 }
 0x835   :  { %v705_v0 = vmul.f32 %v1535_v56, %v704_v62 }
 0x837   :  { %v709_v1 = vsel %vm708_vm6, %v1535_v56, %v705_v0 }
 0x838   :  { %v711_v3 = vmul.f32 %v709_v1, %v677_v10 }
 0x83a   :  { %v716_v4 = vpack.c.bf16 %v711_v3, %v710_v2 }
 0x83c   :  { %1356 = vmatmul.msk.bf16.vlgmr.msrb.gmra.mxu2 %vm231_vm0, %v716_v4  ;;  %1365 = vmatmul.msk.bf16.vlgmr.msrb.gmra.mxu3 %vm231_vm0, %v716_v4 }
 0x83d   :  { %1374 = vmatmul.msk.bf16.vlgmr.msra.gmra.mxu0 %vm231_vm0, %v716_v4 }
 0x8ba   :  { %v807_v5 = vpop.f32.mrf.mxu0 }
 0x8bb   :  { %v808_v26 = vadd.f32 %v1503_v8, %v807_v5 }
 0x8bf   :  { %v775_v7 = vpop.f32.mrf.mxu3  ;;  %v743_v9 = vpop.f32.mrf.mxu2 }
 0x8c0   :  { %v776_v15 = vadd.f32 %v1505_v13, %v775_v7  ;;  %v744_v22 = vadd.f32 %v1504_v18, %v743_v9  ;;  %v1472_v7 = vld [vmem:[#allocation5 + $0x148] sm:$0xff] }
 0x8c1   :  { %997 = vmatpush.bf16.msrb.mxu0 %v1472_v7 }
 0x8c2   :  { %v809_v11 = vpop.f32.mrf.mxu0 }
 0x8c3   :  { %v810_v12 = vadd.f32 %v1503_v8, %v809_v11  ;;  %v1471_v8 = vld [vmem:[#allocation5 + $0x140] sm:$0xff] }
 0x8c5   :  { %876 = vmatpush.msra.mxu2 %v810_v12  ;;  %998 = vmatpush.bf16.msrb.mxu0 %v1471_v8 }
 0x8c7   :  { %877 = vmatpush.msra.mxu2 %v808_v26  ;;  %v777_v14 = vpop.f32.mrf.mxu3  ;;  %v745_v32 = vpop.f32.mrf.mxu2 }
 0x8c8   :  { %v778_v16 = vadd.f32 %v1505_v13, %v777_v14  ;;  %v746_v21 = vadd.f32 %v1504_v18, %v745_v32 }
 0x8ca   :  { %v813_v17 = vpack.c.bf16 %v778_v16, %v776_v15  ;;  %v812_v23 = vpack.c.bf16 %v746_v21, %v744_v22 }
 0x8cc   :  { %v818_v19 = vsel %vm231_vm0, %v813_v17, 0 }
 0x8cd   :  { %827 = vmatpush.bf16.xpose.msra.mxu1 %v818_v19 }
 0x8d4   :  { %1375 = vmatmul.msk.bf16.vlgmr.msra.gmra.mxu1 %vm231_vm0, %v812_v23 }
 0x951   :  { %v829_v25 = vpop.f32.mrf.mxu1 }
 0x952   :  { %v830_v27 = vadd.f32 %v1483_v37, %v829_v25 }
 0x954   :  { %v834_v28 = vsel %vm405_vm8, %v830_v27, -inf }
 0x955   :  { %835 = vmax.xlane.f32.xlu1 %v834_v28 }
 0x959   :  { %v831_v6 = vpop.f32.mrf.mxu1 }
 0x95a   :  { %v832_v29 = vadd.f32 %v1484_v42, %v831_v6 }
 0x95c   :  { %v837_v30 = vsel %vm405_vm8, %v832_v29, -inf }
 0x95d   :  { %838 = vmax.xlane.f32.xlu2 %v837_v30 }
 0x9c8   :  { %v836_v31 = vpop.xlane.xlu1 %835 }
 0x9c9   :  { %v840_v33 = vsub.f32 %v830_v27, %v836_v31 }
 0x9cb   :  { %v842_v10 = vmul.f32 1.442695, %v840_v33 }
 0x9cd   :  { %1536 = vpow2.f32 %v842_v10  ;;  %v1478_v10 = vld [vmem:[#allocation5 + $0x178] sm:$0xff] }
 0x9ce   :  { %1077 = vmatpush.bf16.msrb.mxu1 %v1478_v10 }
 0x9d0   :  { %v839_v34 = vpop.xlane.xlu2 %838 }
 0x9d1   :  { %v841_v35 = vsub.f32 %v832_v29, %v839_v34  ;;  %v1477_v34 = vld [vmem:[#allocation5 + $0x170] sm:$0xff] }
 0x9d2   :  { %1078 = vmatpush.bf16.msrb.mxu1 %v1477_v34 }
 0x9d3   :  { %v1537_v38 = vpop.eup %1536  ;;  %v844_v39 = vmul.f32 1.442695, %v841_v35  ;;  %v1476_v35 = vld [vmem:[#allocation5 + $0x168] sm:$0xff] }
 0x9d4   :  { %v846_v37 = vsel %vm405_vm8, %v1537_v38, 0.0 }
 0x9d5   :  { %1538 = vpow2.f32 %v844_v39  ;;  %847 = vadd.xlane.f32.xlu0 %v846_v37  ;;  %v1474_v39 = vld [vmem:[#allocation5 + $0x158] sm:$0xff] }
 0x9d6   :  { %1079 = vmatpush.bf16.msrb.mxu1 %v1476_v35  ;;  %v1507_v37 = vld [vmem:[#allocation7 + $0x1c] ss:$0 sm:$0xff] }
 0x9db   :  { %v1539_v41 = vpop.eup %1538 }
 0x9dc   :  { %v849_v43 = vsel %vm405_vm8, %v1539_v41, 0.0 }
 0x9dd   :  { %850 = vadd.xlane.f32.xlu1 %v849_v43  ;;  %v1473_v43 = vld [vmem:[#allocation5 + $0x150] sm:$0xff] }
 0xa48   :  { %v848_v36 = vpop.xlane.xlu0 %847 }
 0xa49   :  { %1540 = vrcp.f32 %v848_v36 }
 0xa4f   :  { %v1541_v42 = vpop.eup %1540 }
 0xa50   :  { %v854_v44 = vmul.f32 %v1541_v42, %v1537_v38  ;;  %v851_v45 = vpop.xlane.xlu1 %850  ;;  %v1475_v38 = vld [vmem:[#allocation5 + $0x160] sm:$0xff] }
 0xa51   :  { %1542 = vrcp.f32 %v851_v45  ;;  %1080 = vmatpush.bf16.msrb.mxu1 %v1475_v38 }
 0xa52   :  { %1376 = vmatmul.msk.f32.vlgmr.msra.gmra.mxu2 %vm405_vm8, %v854_v44 }
 0xa55   :  { %1081 = vmatpush.bf16.msrb.mxu1 %v1474_v39 }
 0xa57   :  { %v1543_v46 = vpop.eup %1542 }
 0xa58   :  { %v855_v47 = vmul.f32 %v1543_v46, %v1539_v41 }
 0xa59   :  { %1082 = vmatpush.bf16.msrb.mxu1 %v1473_v43 }
 0xa5a   :  { %1377 = vmatmul.msk.f32.gmra.mxu2 %vm405_vm8, %v855_v47 }
 0xad5   :  { %v879_v50 = vpop.f32.mrf.mxu2 }
 0xadd   :  { %v882_v51 = vpop.f32.mrf.mxu2 }
 0xade   :  { %v889_v52 = vpack.c.bf16 %v882_v51, %v879_v50 }
 0xae0   :  { %1386 = vmatmul.msk.bf16.vlgmr.msra.gmra.mxu3 %vm231_vm0, %v889_v52 }
 0xb63   :  { %v914_v54 = vpop.f32.mrf.mxu3 }
 0xb64   :  { %v919_v55 = vadd.f32 %v914_v54, %v1757_v20 }
 0xb66   :  { %v1791_v56 = vadd.f32 %v1506_v53, %v919_v55 }
 0xb68   :  { %v925_v57 = vsel %vm231_vm0, %v1791_v56, 0.0 }
 0xb69   :  { %926 = vadd.xlane.f32.xlu2 %v925_v57 }
 0xb6b   :  { %v916_v58 = vpop.f32.mrf.mxu3 }
 0xb6c   :  { %v920_v59 = vadd.f32 %v916_v58, %v1762_v24 }
 0xb6e   :  { %v1796_v60 = vadd.f32 %v1506_v53, %v920_v59 }
 0xb70   :  { %v928_v61 = vsel %vm231_vm0, %v1796_v60, 0.0 }
 0xb71   :  { %929 = vadd.xlane.f32.xlu0 %v928_v61 }
 0xbdc   :  { %v927_v62 = vpop.xlane.xlu2 %926 }
 0xbdd   :  { %v931_v63 = vmul.f32 %v927_v62, %v1706_v40 }
 0xbdf   :  { %v933_v20 = vsub.f32 %v1791_v56, %v931_v63 }
 0xbe1   :  { %v935_v0 = vmul.f32 %v933_v20, %v933_v20 }
 0xbe3   :  { %v937_v1 = vsel %vm231_vm0, %v935_v0, 0.0 }
 0xbe4   :  { %938 = vadd.xlane.f32.xlu1 %v937_v1  ;;  %v930_v2 = vpop.xlane.xlu0 %929  ;;  %v1508_v1 = vld [vmem:[#allocation7 + $0x1d] ss:$0 sm:$0xff] }
 0xbe5   :  { %v932_v3 = vmul.f32 %v930_v2, %v1706_v40 }
 0xbe7   :  { %v934_v24 = vsub.f32 %v1796_v60, %v932_v3 }
 0xbe9   :  { %v936_v4 = vmul.f32 %v934_v24, %v934_v24 }
 0xbeb   :  { %v940_v5 = vsel %vm231_vm0, %v936_v4, 0.0 }
 0xbec   :  { %941 = vadd.xlane.f32.xlu2 %v940_v5 }
 0xc57   :  { %v939_v9 = vpop.xlane.xlu1 %938 }
 0xc58   :  { %v943_v11 = vmul.f32 %v939_v9, %v1706_v40 }
 0xc5a   :  { %v945_v12 = vadd.f32 1e-05, %v943_v11 }
 0xc5c   :  { %1544 = vrsqrt.f32 %v945_v12  ;;  %vm953_vm9 = vweird.f32 %v945_v12 }
 0xc5f   :  { %v942_v13 = vpop.xlane.xlu2 %941 }
 0xc60   :  { %v944_v26 = vmul.f32 %v942_v13, %v1706_v40 }
 0xc62   :  { %v1545_v14 = vpop.eup %1544  ;;  %v946_v15 = vadd.f32 1e-05, %v944_v26 }
 0xc63   :  { %v948_v16 = vmul.f32 %v1545_v14, %v945_v12  ;;  %vm954_vm7 = vweird.f32 %v1545_v14 }
 0xc64   :  { %1546 = vrsqrt.f32 %v946_v15  ;;  %vm955_vm11 = vmor %vm953_vm9, %vm954_vm7  ;;  %vm963_vm12 = vweird.f32 %v946_v15 }
 0xc65   :  { %v949_v17 = vmul.f32 %v1545_v14, %v948_v16 }
 0xc67   :  { %v950_v32 = vmul.f32 0.5, %v949_v17 }
 0xc69   :  { %v951_v19 = vsub.f32 1.5, %v950_v32 }
 0xc6a   :  { %v1547_v18 = vpop.eup %1546 }
 0xc6b   :  { %v958_v21 = vmul.f32 %v1547_v18, %v946_v15  ;;  %v952_v23 = vmul.f32 %v1545_v14, %v951_v19  ;;  %vm964_vm10 = vweird.f32 %v1547_v18 }
 0xc6c   :  { %vm965_vm13 = vmor %vm963_vm12, %vm964_vm10 }
 0xc6d   :  { %v959_v22 = vmul.f32 %v1547_v18, %v958_v21  ;;  %v956_v28 = vsel %vm955_vm11, %v1545_v14, %v952_v23  ;;  %v1480_v21 = vld [vmem:[#allocation5 + $0x188] sm:$0xff] }
 0xc6e   :  { %v967_v30 = vmul.f32 %v956_v28, %v933_v20  ;;  %1185 = vmatpush.bf16.msrb.mxu3 %v1480_v21 }
 0xc6f   :  { %v960_v25 = vmul.f32 0.5, %v959_v22 }
 0xc71   :  { %v961_v27 = vsub.f32 1.5, %v960_v25 }
 0xc73   :  { %v962_v6 = vmul.f32 %v1547_v18, %v961_v27 }
 0xc75   :  { %v966_v29 = vsel %vm965_vm13, %v1547_v18, %v962_v6 }
 0xc76   :  { %v968_v31 = vmul.f32 %v966_v29, %v934_v24 }
 0xc78   :  { %v973_v33 = vpack.c.bf16 %v968_v31, %v967_v30 }
 0xc7a   :  { %1395 = vmatmul.msk.bf16.vlgmr.msrb.gmra.mxu0 %vm231_vm0, %v973_v33 }
 0xcf7   :  { %v1000_v41 = vpop.f32.mrf.mxu0 }
 0xcf8   :  { %v1001_v36 = vadd.f32 %v1507_v37, %v1000_v41 }
 0xcfa   :  { %v1005_v42 = vmul.f32 %v1001_v36, %v1001_v36 }
 0xcfc   :  { %v1007_v44 = vmul.f32 %v1005_v42, %v1001_v36  ;;  %v1139_v42 = vld [vmem:[#allocation5 + $0x198] sm:$0x1] }
 0xcfe   :  { %v1009_v45 = vmul.f32 0.044715, %v1007_v44  ;;  %v1479_v44 = vld [vmem:[#allocation5 + $0x180] sm:$0xff] }
 0xcff   :  { %v1002_v46 = vpop.f32.mrf.mxu0  ;;  %1186 = vmatpush.bf16.msrb.mxu3 %v1479_v44 }
 0xd00   :  { %v1011_v47 = vadd.f32 %v1009_v45, %v1001_v36  ;;  %v1003_v48 = vadd.f32 %v1507_v37, %v1002_v46 }
 0xd02   :  { %v1013_v49 = vmul.f32 0.7978846, %v1011_v47  ;;  %v1006_v50 = vmul.f32 %v1003_v48, %v1003_v48 }
 0xd04   :  { %v1008_v51 = vmul.f32 %v1006_v50, %v1003_v48  ;;  %1548 = vtanh.f32 %v1013_v49 }
 0xd06   :  { %v1010_v52 = vmul.f32 0.044715, %v1008_v51 }
 0xd08   :  { %v1012_v53 = vadd.f32 %v1010_v52, %v1003_v48 }
 0xd0a   :  { %v1014_v54 = vmul.f32 0.7978846, %v1012_v53  ;;  %v1549_v55 = vpop.eup %1548 }
 0xd0b   :  { %v1017_v57 = vadd.f32 1.0, %v1549_v55 }
 0xd0c   :  { %1550 = vtanh.f32 %v1014_v54 }
 0xd0d   :  { %v1019_v59 = vmul.f32 0.5, %v1017_v57 }
 0xd0f   :  { %v1021_v63 = vmul.f32 %v1019_v59, %v1001_v36 }
 0xd12   :  { %v1551_v58 = vpop.eup %1550 }
 0xd13   :  { %v1018_v61 = vadd.f32 1.0, %v1551_v58 }
 0xd15   :  { %v1020_v62 = vmul.f32 0.5, %v1018_v61 }
 0xd17   :  { %v1022_v20 = vmul.f32 %v1020_v62, %v1003_v48  ;;  %v1509_v48 = vld [vmem:[#allocation7 + $0x20] ss:$0 sm:$0xff] }
 0xd19   :  { %v1035_v0 = vpack.c.bf16 %v1022_v20, %v1021_v63 }
 0xd1b   :  { %1420 = vmatmul.msk.bf16.vlgmr.msrb.gmra.mxu1 %vm644_vm15, %v1035_v0 }
 0xd98   :  { %v1084_v2 = vpop.f32.mrf.mxu1 }
 0xd99   :  { %v1089_v3 = vadd.f32 %v1084_v2, %v1791_v56 }
 0xd9b   :  { %v1093_v24 = vadd.f32 %v1508_v1, %v1089_v3 }
 0xd9d   :  { %v1095_v4 = vsel %vm231_vm0, %v1093_v24, 0.0 }
 0xd9e   :  { %1096 = vadd.xlane.f32.xlu0 %v1095_v4 }
 0xda0   :  { %v1086_v5 = vpop.f32.mrf.mxu1 }
 0xda1   :  { %v1090_v7 = vadd.f32 %v1086_v5, %v1796_v60 }
 0xda3   :  { %v1094_v8 = vadd.f32 %v1508_v1, %v1090_v7 }
 0xda5   :  { %v1098_v9 = vsel %vm231_vm0, %v1094_v8, 0.0 }
 0xda6   :  { %1099 = vadd.xlane.f32.xlu1 %v1098_v9 }
 0xe11   :  { %v1097_v11 = vpop.xlane.xlu0 %1096 }
 0xe12   :  { %v1101_v12 = vmul.f32 %v1097_v11, %v1706_v40 }
 0xe14   :  { %v1103_v13 = vsub.f32 %v1093_v24, %v1101_v12 }
 0xe16   :  { %v1105_v26 = vmul.f32 %v1103_v13, %v1103_v13 }
 0xe18   :  { %v1107_v14 = vsel %vm231_vm0, %v1105_v26, 0.0 }
 0xe19   :  { %1108 = vadd.xlane.f32.xlu2 %v1107_v14  ;;  %v1100_v56 = vpop.xlane.xlu1 %1099 }
 0xe1a   :  { %v1102_v15 = vmul.f32 %v1100_v56, %v1706_v40 }
 0xe1c   :  { %v1104_v16 = vsub.f32 %v1094_v8, %v1102_v15 }
 0xe1e   :  { %v1106_v17 = vmul.f32 %v1104_v16, %v1104_v16 }
 0xe20   :  { %v1110_v32 = vsel %vm231_vm0, %v1106_v17, 0.0 }
 0xe21   :  { %1111 = vadd.xlane.f32.xlu0 %v1110_v32 }
 0xe8c   :  { %v1109_v60 = vpop.xlane.xlu2 %1108 }
 0xe8d   :  { %v1113_v18 = vmul.f32 %v1109_v60, %v1706_v40 }
 0xe8f   :  { %v1115_v19 = vadd.f32 1e-05, %v1113_v18 }
 0xe91   :  { %1552 = vrsqrt.f32 %v1115_v19  ;;  %vm1123_vm15 = vweird.f32 %v1115_v19 }
 0xe94   :  { %v1112_v22 = vpop.xlane.xlu0 %1111 }
 0xe95   :  { %v1114_v23 = vmul.f32 %v1112_v22, %v1706_v40 }
 0xe97   :  { %v1553_v25 = vpop.eup %1552  ;;  %v1116_v27 = vadd.f32 1e-05, %v1114_v23 }
 0xe98   :  { %v1118_v28 = vmul.f32 %v1553_v25, %v1115_v19  ;;  %vm1124_vm14 = vweird.f32 %v1553_v25 }
 0xe99   :  { %1554 = vrsqrt.f32 %v1116_v27  ;;  %vm1125_vm2 = vmor %vm1123_vm15, %vm1124_vm14  ;;  %vm1133_vm3 = vweird.f32 %v1116_v27 }
 0xe9a   :  { %v1119_v6 = vmul.f32 %v1553_v25, %v1118_v28 }
 0xe9c   :  { %v1120_v29 = vmul.f32 0.5, %v1119_v6 }
 0xe9e   :  { %v1121_v31 = vsub.f32 1.5, %v1120_v29 }
 0xe9f   :  { %v1555_v30 = vpop.eup %1554 }
 0xea0   :  { %v1128_v33 = vmul.f32 %v1555_v30, %v1116_v27  ;;  %v1122_v34 = vmul.f32 %v1553_v25, %v1121_v31  ;;  %vm1134_vm1 = vweird.f32 %v1555_v30 }
 0xea1   :  { %vm1135_vm4 = vmor %vm1133_vm3, %vm1134_vm1 }
 0xea2   :  { %v1129_v10 = vmul.f32 %v1555_v30, %v1128_v33  ;;  %v1126_v39 = vsel %vm1125_vm2, %v1553_v25, %v1122_v34 }
 0xea3   :  { %v1137_v41 = vmul.f32 %v1126_v39, %v1103_v13 }
 0xea4   :  { %v1130_v35 = vmul.f32 0.5, %v1129_v10 }
 0xea6   :  { %v1131_v38 = vsub.f32 1.5, %v1130_v35 }
 0xea8   :  { %v1132_v37 = vmul.f32 %v1555_v30, %v1131_v38 }
 0xeaa   :  { %v1136_v40 = vsel %vm1135_vm4, %v1555_v30, %v1132_v37 }
 0xeab   :  { %v1138_v43 = vmul.f32 %v1136_v40, %v1104_v16 }
 0xead   :  { %v1140_v36 = vpack.c.bf16 %v1138_v43, %v1137_v41 }
 0xeaf   :  { %1151 = vmatpush.bf16.msrb.mxu2 %v1140_v36 }
 0xeb2   :  { %1421 = vmatmul.msk.bf16.vlgmr.msrb.gmra.mxu2 %vm405_vm8, %v1139_v42 }
 0xf35   :  { %v1153_v45 = vpop.f32.mrf.mxu2 }
 0xf36   :  { %v1157_v46 = vpack.c.bf16 %v1153_v45, %v1153_v45 }
 0xf38   :  { %1430 = vmatmul.msk.bf16.vlgmr.msrb.gmra.mxu3 %vm231_vm0, %v1157_v46 }
 0xf3d   :  { %v1155_v47 = vpop.f32.mrf.mxu2 }
 0xfbb   :  { %v1188_v49 = vpop.f32.mrf.mxu3 }
 0xfbc   :  { %v1189_v50 = vadd.f32 %v1509_v48, %v1188_v49 }
 0xfbe   :  { %1192 = vst [vmem:[#allocation8] sm:$0x3] %v1189_v50 }
 0xfbf   :  { %1203 = dma.vmem_to_hbm [thread:$0]  %s1199_s4, 32, %s1201_s7, [#allocation4]  }
 0xfc3   :  { %v1190_v51 = vpop.f32.mrf.mxu3 }
 0xfc4   :  { %1656 = dma.done.wait [#allocation4], 32  }
 0xfc5   :  { %1657 = vsyncadd [#allocation4], 4294967264 }
 0xfc6   :  { %1208 = vsyncpa [#allocation3], 1 }
 0xfc7   :  { %1209 = vsyncpa [#allocation6], 1 }
 0xfc8   :  { %1210 = vsyncpa [#allocation4], 1 }

</bundles_post_ra>
